<compile_context>
chip_gen: v7x
topology: tpu7x:2x2x1
jax: 0.10.0
libtpu: 0.0.40
codegen_flags: <defaults>
</compile_context>

<pallas_src>
import math
import jax
import jax.numpy as jnp
from jax.experimental import pallas as pl
from jax.experimental.pallas import tpu as pltpu

# --- small mBART-style encoder config ---
VOCAB      = 100
D_MODEL    = 32
N_HEADS    = 4
HEAD_DIM   = D_MODEL // N_HEADS
FFN_DIM    = 64
N_LAYERS   = 2
MAX_POS    = 64
POS_OFFSET = 2          # mBART learned positional embedding offset
LN_EPS     = 1e-5
NEG_INF    = -1e9


# ---------------------------------------------------------------------------
# Fused encoder kernel (emb-LN + all layers + final LN in one body)
# ---------------------------------------------------------------------------
def _layernorm(x, g, b):
    mu = jnp.mean(x, axis=-1, keepdims=True)
    var = jnp.mean(jnp.square(x - mu), axis=-1, keepdims=True)
    return (x - mu) * jax.lax.rsqrt(var + LN_EPS) * g + b


def _make_fused_encoder_kernel(bp_block, seq_len):
    """Whole encoder stack for one block of `bp_block` passages, fused into a
    single kernel body. Activations stay resident in VMEM/vregs for the entire
    forward; only the packed weights and the activation block are DMA'd."""
    L = seq_len
    M = bp_block * L
    scale = 1.0 / math.sqrt(HEAD_DIM)

    def kernel(h_ref, mask_ref, lnef_ref, wqkv_ref, bqkv_ref, wo_ref, bo_ref,
               lnl_ref, w1_ref, b1_ref, w2_ref, b2_ref, o_ref):
        h = h_ref[...].astype(jnp.float32)            # (M, D)
        mask = mask_ref[...]                          # (bp_block, 1, L) additive

        # --- embedding layernorm ---
        h = _layernorm(h, lnef_ref[0], lnef_ref[1])

        # Static unroll over the (two) encoder layers: everything stays resident.
        for l in range(N_LAYERS):
            # ---- self-attention block (pre-LN) ----
            residual = h
            x = _layernorm(h, lnl_ref[4 * l + 0], lnl_ref[4 * l + 1])
            # fused QKV projection over the whole (M, D) slab
            qkv = (jnp.dot(x, wqkv_ref[l], preferred_element_type=jnp.float32)
                   + bqkv_ref[l])                                       # (M, 3D)
            q = qkv[:, 0 * D_MODEL:1 * D_MODEL] * scale
            k = qkv[:, 1 * D_MODEL:2 * D_MODEL]
            v = qkv[:, 2 * D_MODEL:3 * D_MODEL]
            q3 = q.reshape(bp_block, L, D_MODEL)
            k3 = k.reshape(bp_block, L, D_MODEL)
            v3 = v.reshape(bp_block, L, D_MODEL)

            # Heads stay a static python loop (N_HEADS=4): Mosaic does not
            # reliably lower multi-batch-dim dot_general / sublane transposes
            # at these tiny non-native shapes, but each head's contraction is
            # now batched over every passage in the block.
            heads = []
            for hh in range(N_HEADS):
                sl = slice(hh * HEAD_DIM, (hh + 1) * HEAD_DIM)
                qh, kh, vh = q3[..., sl], k3[..., sl], v3[..., sl]
                s = jnp.einsum('bqd,bkd->bqk', qh, kh,
                               preferred_element_type=jnp.float32) + mask  # (B,L,L)
                s = s - jnp.max(s, axis=-1, keepdims=True)
                p = jnp.exp(s)
                # softmax denom on the EUP (approx reciprocal) instead of a VPU divide
                p = p * pl.reciprocal(jnp.sum(p, axis=-1, keepdims=True),
                                      approx=True)
                heads.append(jnp.einsum('bqk,bkd->bqd', p, vh,
                                        preferred_element_type=jnp.float32))
            ctx = jnp.concatenate(heads, axis=-1).reshape(M, D_MODEL)
            attn = (jnp.dot(ctx, wo_ref[l], preferred_element_type=jnp.float32)
                    + bo_ref[l])
            h = residual + attn

            # ---- feed-forward block (pre-LN) ----
            residual = h
            x = _layernorm(h, lnl_ref[4 * l + 2], lnl_ref[4 * l + 3])
            x = jnp.dot(x, w1_ref[l], preferred_element_type=jnp.float32) + b1_ref[l]
            # TODO(synk): mBART uses exact (erf) GELU; tanh approximation kept
            # since lax.erf is not reliably lowered by Mosaic.
            x = jax.nn.gelu(x, approximate=True)
            x = jnp.dot(x, w2_ref[l], preferred_element_type=jnp.float32) + b2_ref[l]
            h = residual + x

        # --- final layernorm ---
        h = _layernorm(h, lnef_ref[2], lnef_ref[3])
        o_ref[...] = h.astype(o_ref.dtype)

    return kernel


# ---------------------------------------------------------------------------
# pallas_call wrapper
# ---------------------------------------------------------------------------
def _choose_bp_block(bp, seq_len):
    # Prefer 2 grid steps when the blocking stays (8,128)-legal: lets v7x shard
    # independent passage blocks across its two TensorCores ("parallel" axis),
    # while costing single-TC v5e/v6e only one extra ~0.35us sequential step.
    if bp % 2 == 0 and ((bp // 2) * seq_len) % 8 == 0:
        return bp // 2
    return bp


def pallas_fused_encoder(h_flat, mask_add, packed):
    """h_flat: (B*P*L, D) f32, mask_add: (B*P, 1, L) additive mask."""
    m_total, d = h_flat.shape
    bp = mask_add.shape[0]
    seq_len = m_total // bp
    bp_block = _choose_bp_block(bp, seq_len)
    n_blocks = bp // bp_block
    m_block = bp_block * seq_len

    kernel = _make_fused_encoder_kernel(bp_block, seq_len)

    def full_spec(a):
        return pl.BlockSpec(a.shape, lambda i, _nd=a.ndim: (0,) * _nd)

    in_specs = [pl.BlockSpec((m_block, d), lambda i: (i, 0)),
                pl.BlockSpec((bp_block, 1, seq_len), lambda i: (i, 0, 0))]
    in_specs += [full_spec(a) for a in packed]

    return pl.pallas_call(
        kernel,
        out_shape=jax.ShapeDtypeStruct((m_total, d), h_flat.dtype),
        grid=(n_blocks,),
        in_specs=in_specs,
        out_specs=pl.BlockSpec((m_block, d), lambda i: (i, 0)),
        compiler_params=pltpu.CompilerParams(
            dimension_semantics=("parallel",)),
    )(h_flat, mask_add, *packed)


# ---------------------------------------------------------------------------
# Parameter init (deterministic, synthetic) + packing for the fused kernel
# ---------------------------------------------------------------------------
def init_params(key):
    n_keys = 2 + N_LAYERS
    keys = jax.random.split(key, n_keys)
    p = {
        "embed": 0.02 * jax.random.normal(keys[0], (VOCAB, D_MODEL), jnp.float32),
        "pos":   0.02 * jax.random.normal(keys[1], (MAX_POS + POS_OFFSET, D_MODEL),
                                          jnp.float32),
        "ln_emb_g": jnp.ones((1, D_MODEL), jnp.float32),
        "ln_emb_b": jnp.zeros((1, D_MODEL), jnp.float32),
        "ln_f_g":   jnp.ones((1, D_MODEL), jnp.float32),
        "ln_f_b":   jnp.zeros((1, D_MODEL), jnp.float32),
        "layers": [],
    }
    for l in range(N_LAYERS):
        lk = jax.random.split(keys[2 + l], 6)
        layer = {
            "ln1_g": jnp.ones((1, D_MODEL), jnp.float32),
            "ln1_b": jnp.zeros((1, D_MODEL), jnp.float32),
            "wq": 0.02 * jax.random.normal(lk[0], (D_MODEL, D_MODEL), jnp.float32),
            "bq": jnp.zeros((1, D_MODEL), jnp.float32),
            "wk": 0.02 * jax.random.normal(lk[1], (D_MODEL, D_MODEL), jnp.float32),
            "bk": jnp.zeros((1, D_MODEL), jnp.float32),
            "wv": 0.02 * jax.random.normal(lk[2], (D_MODEL, D_MODEL), jnp.float32),
            "bv": jnp.zeros((1, D_MODEL), jnp.float32),
            "wo": 0.02 * jax.random.normal(lk[3], (D_MODEL, D_MODEL), jnp.float32),
            "bo": jnp.zeros((1, D_MODEL), jnp.float32),
            "ln2_g": jnp.ones((1, D_MODEL), jnp.float32),
            "ln2_b": jnp.zeros((1, D_MODEL), jnp.float32),
            "w1": 0.02 * jax.random.normal(lk[4], (D_MODEL, FFN_DIM), jnp.float32),
            "b1": jnp.zeros((1, FFN_DIM), jnp.float32),
            "w2": 0.02 * jax.random.normal(lk[5], (FFN_DIM, D_MODEL), jnp.float32),
            "b2": jnp.zeros((1, D_MODEL), jnp.float32),
        }
        p["layers"].append(layer)
    return p


def pack_params(p):
    """Pack per-layer weights into a few stacked arrays for the fused kernel."""
    layers = p["layers"]
    lnef = jnp.stack([p["ln_emb_g"], p["ln_emb_b"],
                      p["ln_f_g"], p["ln_f_b"]])                       # (4, 1, D)
    wqkv = jnp.stack([jnp.concatenate([l["wq"], l["wk"], l["wv"]], axis=1)
                      for l in layers])                                # (NL, D, 3D)
    bqkv = jnp.stack([jnp.concatenate([l["bq"], l["bk"], l["bv"]], axis=1)
                      for l in layers])                                # (NL, 1, 3D)
    wo = jnp.stack([l["wo"] for l in layers])                          # (NL, D, D)
    bo = jnp.stack([l["bo"] for l in layers])                          # (NL, 1, D)
    lnl = jnp.concatenate([jnp.stack([l["ln1_g"], l["ln1_b"],
                                      l["ln2_g"], l["ln2_b"]])
                           for l in layers])                           # (4*NL, 1, D)
    w1 = jnp.stack([l["w1"] for l in layers])                          # (NL, D, F)
    b1 = jnp.stack([l["b1"] for l in layers])                          # (NL, 1, F)
    w2 = jnp.stack([l["w2"] for l in layers])                          # (NL, F, D)
    b2 = jnp.stack([l["b2"] for l in layers])                          # (NL, 1, D)
    return (lnef, wqkv, bqkv, wo, bo, lnl, w1, b1, w2, b2)


# ---------------------------------------------------------------------------
# EncoderWrapper forward (Fusion-in-Decoder)
# ---------------------------------------------------------------------------
def encoder_wrapper_forward(params, packed, input_ids, attention_mask, n_passages):
    bsz, total_length = input_ids.shape
    passage_length = total_length // n_passages
    # FiD reshape: (B, P*L) -> (B*P, L)
    input_ids = input_ids.reshape(bsz * n_passages, passage_length)
    attention_mask = attention_mask.reshape(bsz * n_passages, passage_length)

    # embedding gather (plain JAX), scaled by sqrt(d_model), + learned positions
    h = params["embed"][input_ids] * math.sqrt(D_MODEL)
    pos = params["pos"][POS_OFFSET + jnp.arange(passage_length)]
    h = (h + pos[None]).astype(jnp.float32)                            # (B*P, L, D)
    h = h.reshape(bsz * n_passages * passage_length, D_MODEL)          # (B*P*L, D)

    # additive attention mask: (B*P, 1, L)
    mask_add = ((1.0 - attention_mask.astype(jnp.float32)) * NEG_INF)[:, None, :]

    # fused: embedding LN + N_LAYERS encoder layers + final LN (one pallas_call)
    h = pallas_fused_encoder(h, mask_add, packed)                      # (B*P*L, D)

    # FiD concat: -> (B, P*L, D)
    return h.reshape(bsz, n_passages * passage_length, D_MODEL)


if __name__ == "__main__":
    key = jax.random.PRNGKey(0)
    pkey, ikey = jax.random.split(key)
    params = init_params(pkey)
    packed = pack_params(params)

    bsz, n_passages, passage_length = 2, 2, 8
    total_length = n_passages * passage_length          # 16

    input_ids = jax.random.randint(ikey, (bsz, total_length), 0, VOCAB, jnp.int32)
    # mask out the last 2 tokens of the second passage of each batch element
    attention_mask = jnp.ones((bsz, total_length), jnp.int32)
    attention_mask = attention_mask.at[:, total_length - 2:].set(0)

    out = encoder_wrapper_forward(params, packed, input_ids, attention_mask,
                                  n_passages)
    out = jax.block_until_ready(out)
    assert out.shape == (bsz, n_passages * passage_length, D_MODEL)
    assert bool(jnp.all(jnp.isfinite(out)))
    print("KERNEL_OK")
</pallas_src>

<mosaic_0001>
module attributes {stable_mosaic.version = 11 : i64} {
  func.func @kernel(%arg0: i32, %arg1: memref<16x32xf32, #tpu.memory_space<vmem>>, %arg2: memref<2x1x8xf32, #tpu.memory_space<vmem>>, %arg3: memref<4x1x32xf32, #tpu.memory_space<vmem>>, %arg4: memref<2x32x96xf32, #tpu.memory_space<vmem>>, %arg5: memref<2x1x96xf32, #tpu.memory_space<vmem>>, %arg6: memref<2x32x32xf32, #tpu.memory_space<vmem>>, %arg7: memref<2x1x32xf32, #tpu.memory_space<vmem>>, %arg8: memref<8x1x32xf32, #tpu.memory_space<vmem>>, %arg9: memref<2x32x64xf32, #tpu.memory_space<vmem>>, %arg10: memref<2x1x64xf32, #tpu.memory_space<vmem>>, %arg11: memref<2x64x32xf32, #tpu.memory_space<vmem>>, %arg12: memref<2x1x32xf32, #tpu.memory_space<vmem>>, %arg13: memref<16x32xf32, #tpu.memory_space<vmem>>) attributes {dimension_semantics = [#tpu.dimension_semantics<parallel>], iteration_bounds = array<i64: 2>, scalar_prefetch = 0 : i64, scratch_operands = 0 : i64, tpu.core_type = #tpu.core_type<tc>, window_params = [{transform_indices = @transform_0, window_bounds = array<i64: 16, 32>}, {transform_indices = @transform_1, window_bounds = array<i64: 2, 1, 8>}, {pipeline_mode = #tpu.pipeline_mode<synchronous>, transform_indices = @transform_2, window_bounds = array<i64: 4, 1, 32>}, {pipeline_mode = #tpu.pipeline_mode<synchronous>, transform_indices = @transform_3, window_bounds = array<i64: 2, 32, 96>}, {pipeline_mode = #tpu.pipeline_mode<synchronous>, transform_indices = @transform_4, window_bounds = array<i64: 2, 1, 96>}, {pipeline_mode = #tpu.pipeline_mode<synchronous>, transform_indices = @transform_5, window_bounds = array<i64: 2, 32, 32>}, {pipeline_mode = #tpu.pipeline_mode<synchronous>, transform_indices = @transform_6, window_bounds = array<i64: 2, 1, 32>}, {pipeline_mode = #tpu.pipeline_mode<synchronous>, transform_indices = @transform_7, window_bounds = array<i64: 8, 1, 32>}, {pipeline_mode = #tpu.pipeline_mode<synchronous>, transform_indices = @transform_8, window_bounds = array<i64: 2, 32, 64>}, {pipeline_mode = #tpu.pipeline_mode<synchronous>, transform_indices = @transform_9, window_bounds = array<i64: 2, 1, 64>}, {pipeline_mode = #tpu.pipeline_mode<synchronous>, transform_indices = @transform_10, window_bounds = array<i64: 2, 64, 32>}, {pipeline_mode = #tpu.pipeline_mode<synchronous>, transform_indices = @transform_11, window_bounds = array<i64: 2, 1, 32>}, {transform_indices = @transform_12, window_bounds = array<i64: 16, 32>}]} {
    %c0 = arith.constant 0 : index
    %c0_0 = arith.constant 0 : index
    %0 = vector.load %arg1[%c0, %c0_0] : memref<16x32xf32, #tpu.memory_space<vmem>>, vector<16x32xf32>
    %c0_1 = arith.constant 0 : index
    %c0_2 = arith.constant 0 : index
    %c0_3 = arith.constant 0 : index
    %1 = vector.load %arg2[%c0_1, %c0_2, %c0_3] : memref<2x1x8xf32, #tpu.memory_space<vmem>>, vector<2x1x8xf32>
    %c0_4 = arith.constant 0 : index
    %c0_5 = arith.constant 0 : index
    %c0_6 = arith.constant 0 : index
    %2 = vector.load %arg3[%c0_4, %c0_5, %c0_6] : memref<4x1x32xf32, #tpu.memory_space<vmem>>, vector<1x1x32xf32>
    %3 = vector.shape_cast %2 : vector<1x1x32xf32> to vector<1x32xf32>
    %c1 = arith.constant 1 : index
    %c0_7 = arith.constant 0 : index
    %c0_8 = arith.constant 0 : index
    %4 = vector.load %arg3[%c1, %c0_7, %c0_8] : memref<4x1x32xf32, #tpu.memory_space<vmem>>, vector<1x1x32xf32>
    %5 = vector.shape_cast %4 : vector<1x1x32xf32> to vector<1x32xf32>
    %cst = arith.constant dense<0.000000e+00> : vector<16xf32>
    %6 = vector.multi_reduction <add>, %0, %cst [1] : vector<16x32xf32> to vector<16xf32>
    %7 = vector.shape_cast %6 : vector<16xf32> to vector<16x1xf32>
    %cst_9 = arith.constant 3.200000e+01 : f32
    %8 = vector.broadcast %cst_9 : f32 to vector<16x1xf32>
    %9 = arith.divf %7, %8 : vector<16x1xf32>
    %10 = vector.broadcast %9 : vector<16x1xf32> to vector<16x32xf32>
    %11 = arith.subf %0, %10 : vector<16x32xf32>
    %12 = arith.mulf %11, %11 : vector<16x32xf32>
    %cst_10 = arith.constant dense<0.000000e+00> : vector<16xf32>
    %13 = vector.multi_reduction <add>, %12, %cst_10 [1] : vector<16x32xf32> to vector<16xf32>
    %14 = vector.shape_cast %13 : vector<16xf32> to vector<16x1xf32>
    %cst_11 = arith.constant 3.200000e+01 : f32
    %15 = vector.broadcast %cst_11 : f32 to vector<16x1xf32>
    %16 = arith.divf %14, %15 : vector<16x1xf32>
    %17 = vector.broadcast %9 : vector<16x1xf32> to vector<16x32xf32>
    %18 = arith.subf %0, %17 : vector<16x32xf32>
    %cst_12 = arith.constant 9.99999974E-6 : f32
    %19 = vector.broadcast %cst_12 : f32 to vector<16x1xf32>
    %20 = arith.addf %16, %19 : vector<16x1xf32>
    %21 = math.rsqrt %20 : vector<16x1xf32>
    %22 = vector.broadcast %21 : vector<16x1xf32> to vector<16x32xf32>
    %23 = arith.mulf %18, %22 : vector<16x32xf32>
    %24 = vector.broadcast %3 : vector<1x32xf32> to vector<16x32xf32>
    %25 = arith.mulf %23, %24 : vector<16x32xf32>
    %26 = vector.broadcast %5 : vector<1x32xf32> to vector<16x32xf32>
    %27 = arith.addf %25, %26 : vector<16x32xf32>
    %c0_13 = arith.constant 0 : index
    %c0_14 = arith.constant 0 : index
    %c0_15 = arith.constant 0 : index
    %28 = vector.load %arg8[%c0_13, %c0_14, %c0_15] : memref<8x1x32xf32, #tpu.memory_space<vmem>>, vector<1x1x32xf32>
    %29 = vector.shape_cast %28 : vector<1x1x32xf32> to vector<1x32xf32>
    %c1_16 = arith.constant 1 : index
    %c0_17 = arith.constant 0 : index
    %c0_18 = arith.constant 0 : index
    %30 = vector.load %arg8[%c1_16, %c0_17, %c0_18] : memref<8x1x32xf32, #tpu.memory_space<vmem>>, vector<1x1x32xf32>
    %31 = vector.shape_cast %30 : vector<1x1x32xf32> to vector<1x32xf32>
    %cst_19 = arith.constant dense<0.000000e+00> : vector<16xf32>
    %32 = vector.multi_reduction <add>, %27, %cst_19 [1] : vector<16x32xf32> to vector<16xf32>
    %33 = vector.shape_cast %32 : vector<16xf32> to vector<16x1xf32>
    %cst_20 = arith.constant 3.200000e+01 : f32
    %34 = vector.broadcast %cst_20 : f32 to vector<16x1xf32>
    %35 = arith.divf %33, %34 : vector<16x1xf32>
    %36 = vector.broadcast %35 : vector<16x1xf32> to vector<16x32xf32>
    %37 = arith.subf %27, %36 : vector<16x32xf32>
    %38 = arith.mulf %37, %37 : vector<16x32xf32>
    %cst_21 = arith.constant dense<0.000000e+00> : vector<16xf32>
    %39 = vector.multi_reduction <add>, %38, %cst_21 [1] : vector<16x32xf32> to vector<16xf32>
    %40 = vector.shape_cast %39 : vector<16xf32> to vector<16x1xf32>
    %cst_22 = arith.constant 3.200000e+01 : f32
    %41 = vector.broadcast %cst_22 : f32 to vector<16x1xf32>
    %42 = arith.divf %40, %41 : vector<16x1xf32>
    %43 = vector.broadcast %35 : vector<16x1xf32> to vector<16x32xf32>
    %44 = arith.subf %27, %43 : vector<16x32xf32>
    %cst_23 = arith.constant 9.99999974E-6 : f32
    %45 = vector.broadcast %cst_23 : f32 to vector<16x1xf32>
    %46 = arith.addf %42, %45 : vector<16x1xf32>
    %47 = math.rsqrt %46 : vector<16x1xf32>
    %48 = vector.broadcast %47 : vector<16x1xf32> to vector<16x32xf32>
    %49 = arith.mulf %44, %48 : vector<16x32xf32>
    %50 = vector.broadcast %29 : vector<1x32xf32> to vector<16x32xf32>
    %51 = arith.mulf %49, %50 : vector<16x32xf32>
    %52 = vector.broadcast %31 : vector<1x32xf32> to vector<16x32xf32>
    %53 = arith.addf %51, %52 : vector<16x32xf32>
    %c0_24 = arith.constant 0 : index
    %c0_25 = arith.constant 0 : index
    %c0_26 = arith.constant 0 : index
    %54 = vector.load %arg4[%c0_24, %c0_25, %c0_26] : memref<2x32x96xf32, #tpu.memory_space<vmem>>, vector<1x32x96xf32>
    %55 = vector.shape_cast %54 : vector<1x32x96xf32> to vector<32x96xf32>
    %cst_27 = arith.constant dense<0.000000e+00> : vector<16x96xf32>
    %56 = tpu.matmul %53, %55, %cst_27 {dimension_numbers = #tpu.dot_dimension_numbers<[1], [0], [0], [1], [0, 0, 1, 1], [], []>} : vector<16x32xf32>, vector<32x96xf32>, vector<16x96xf32> -> vector<16x96xf32>
    %c0_28 = arith.constant 0 : index
    %c0_29 = arith.constant 0 : index
    %c0_30 = arith.constant 0 : index
    %57 = vector.load %arg5[%c0_28, %c0_29, %c0_30] : memref<2x1x96xf32, #tpu.memory_space<vmem>>, vector<1x1x96xf32>
    %58 = vector.shape_cast %57 : vector<1x1x96xf32> to vector<1x96xf32>
    %59 = vector.broadcast %58 : vector<1x96xf32> to vector<16x96xf32>
    %60 = arith.addf %56, %59 : vector<16x96xf32>
    %61 = vector.extract_strided_slice %60 {offsets = [0, 0], sizes = [16, 32], strides = [1, 1]} : vector<16x96xf32> to vector<16x32xf32>
    %cst_31 = arith.constant 0.353553385 : f32
    %62 = vector.broadcast %cst_31 : f32 to vector<16x32xf32>
    %63 = arith.mulf %61, %62 : vector<16x32xf32>
    %64 = vector.extract_strided_slice %60 {offsets = [0, 32], sizes = [16, 32], strides = [1, 1]} : vector<16x96xf32> to vector<16x32xf32>
    %65 = vector.extract_strided_slice %60 {offsets = [0, 64], sizes = [16, 32], strides = [1, 1]} : vector<16x96xf32> to vector<16x32xf32>
    %66 = vector.shape_cast %63 : vector<16x32xf32> to vector<2x8x32xf32>
    %67 = vector.shape_cast %64 : vector<16x32xf32> to vector<2x8x32xf32>
    %68 = vector.shape_cast %65 : vector<16x32xf32> to vector<2x8x32xf32>
    %69 = vector.extract_strided_slice %66 {offsets = [0, 0, 0], sizes = [2, 8, 8], strides = [1, 1, 1]} : vector<2x8x32xf32> to vector<2x8x8xf32>
    %70 = vector.extract_strided_slice %67 {offsets = [0, 0, 0], sizes = [2, 8, 8], strides = [1, 1, 1]} : vector<2x8x32xf32> to vector<2x8x8xf32>
    %71 = vector.extract_strided_slice %68 {offsets = [0, 0, 0], sizes = [2, 8, 8], strides = [1, 1, 1]} : vector<2x8x32xf32> to vector<2x8x8xf32>
    "tpu.trace_start"() <{level = 10 : i32, message = "bqd,bkd->bqk"}> : () -> ()
    %cst_32 = arith.constant dense<0.000000e+00> : vector<2x8x8xf32>
    %72 = tpu.matmul %69, %70, %cst_32 {dimension_numbers = #tpu.dot_dimension_numbers<[2], [2], [1], [1], [0, 0, 0, 1, 1, 1], [0], [0]>} : vector<2x8x8xf32>, vector<2x8x8xf32>, vector<2x8x8xf32> -> vector<2x8x8xf32>
    "tpu.trace_stop"() : () -> ()
    %73 = vector.broadcast %1 : vector<2x1x8xf32> to vector<2x8x8xf32>
    %74 = arith.addf %72, %73 : vector<2x8x8xf32>
    %cst_33 = arith.constant dense<0xFF800000> : vector<2x8xf32>
    %75 = vector.multi_reduction <maximumf>, %74, %cst_33 [2] : vector<2x8x8xf32> to vector<2x8xf32>
    %76 = vector.shape_cast %75 : vector<2x8xf32> to vector<2x8x1xf32>
    %77 = vector.broadcast %76 : vector<2x8x1xf32> to vector<2x8x8xf32>
    %78 = arith.subf %74, %77 : vector<2x8x8xf32>
    %79 = math.exp %78 : vector<2x8x8xf32>
    %cst_34 = arith.constant dense<0.000000e+00> : vector<2x8xf32>
    %80 = vector.multi_reduction <add>, %79, %cst_34 [2] : vector<2x8x8xf32> to vector<2x8xf32>
    %81 = vector.shape_cast %80 : vector<2x8xf32> to vector<2x8x1xf32>
    %82 = tpu.reciprocal %81 {approx = true} : vector<2x8x1xf32> -> vector<2x8x1xf32>
    %83 = vector.broadcast %82 : vector<2x8x1xf32> to vector<2x8x8xf32>
    %84 = arith.mulf %79, %83 : vector<2x8x8xf32>
    "tpu.trace_start"() <{level = 10 : i32, message = "bqk,bkd->bqd"}> : () -> ()
    %cst_35 = arith.constant dense<0.000000e+00> : vector<2x8x8xf32>
    %85 = tpu.matmul %84, %71, %cst_35 {dimension_numbers = #tpu.dot_dimension_numbers<[2], [1], [1], [2], [0, 0, 0, 1, 1, 2], [0], [0]>} : vector<2x8x8xf32>, vector<2x8x8xf32>, vector<2x8x8xf32> -> vector<2x8x8xf32>
    "tpu.trace_stop"() : () -> ()
    %86 = vector.extract_strided_slice %66 {offsets = [0, 0, 8], sizes = [2, 8, 8], strides = [1, 1, 1]} : vector<2x8x32xf32> to vector<2x8x8xf32>
    %87 = vector.extract_strided_slice %67 {offsets = [0, 0, 8], sizes = [2, 8, 8], strides = [1, 1, 1]} : vector<2x8x32xf32> to vector<2x8x8xf32>
    %88 = vector.extract_strided_slice %68 {offsets = [0, 0, 8], sizes = [2, 8, 8], strides = [1, 1, 1]} : vector<2x8x32xf32> to vector<2x8x8xf32>
    "tpu.trace_start"() <{level = 10 : i32, message = "bqd,bkd->bqk"}> : () -> ()
    %cst_36 = arith.constant dense<0.000000e+00> : vector<2x8x8xf32>
    %89 = tpu.matmul %86, %87, %cst_36 {dimension_numbers = #tpu.dot_dimension_numbers<[2], [2], [1], [1], [0, 0, 0, 1, 1, 1], [0], [0]>} : vector<2x8x8xf32>, vector<2x8x8xf32>, vector<2x8x8xf32> -> vector<2x8x8xf32>
    "tpu.trace_stop"() : () -> ()
    %90 = vector.broadcast %1 : vector<2x1x8xf32> to vector<2x8x8xf32>
    %91 = arith.addf %89, %90 : vector<2x8x8xf32>
    %cst_37 = arith.constant dense<0xFF800000> : vector<2x8xf32>
    %92 = vector.multi_reduction <maximumf>, %91, %cst_37 [2] : vector<2x8x8xf32> to vector<2x8xf32>
    %93 = vector.shape_cast %92 : vector<2x8xf32> to vector<2x8x1xf32>
    %94 = vector.broadcast %93 : vector<2x8x1xf32> to vector<2x8x8xf32>
    %95 = arith.subf %91, %94 : vector<2x8x8xf32>
    %96 = math.exp %95 : vector<2x8x8xf32>
    %cst_38 = arith.constant dense<0.000000e+00> : vector<2x8xf32>
    %97 = vector.multi_reduction <add>, %96, %cst_38 [2] : vector<2x8x8xf32> to vector<2x8xf32>
    %98 = vector.shape_cast %97 : vector<2x8xf32> to vector<2x8x1xf32>
    %99 = tpu.reciprocal %98 {approx = true} : vector<2x8x1xf32> -> vector<2x8x1xf32>
    %100 = vector.broadcast %99 : vector<2x8x1xf32> to vector<2x8x8xf32>
    %101 = arith.mulf %96, %100 : vector<2x8x8xf32>
    "tpu.trace_start"() <{level = 10 : i32, message = "bqk,bkd->bqd"}> : () -> ()
    %cst_39 = arith.constant dense<0.000000e+00> : vector<2x8x8xf32>
    %102 = tpu.matmul %101, %88, %cst_39 {dimension_numbers = #tpu.dot_dimension_numbers<[2], [1], [1], [2], [0, 0, 0, 1, 1, 2], [0], [0]>} : vector<2x8x8xf32>, vector<2x8x8xf32>, vector<2x8x8xf32> -> vector<2x8x8xf32>
    "tpu.trace_stop"() : () -> ()
    %103 = vector.extract_strided_slice %66 {offsets = [0, 0, 16], sizes = [2, 8, 8], strides = [1, 1, 1]} : vector<2x8x32xf32> to vector<2x8x8xf32>
    %104 = vector.extract_strided_slice %67 {offsets = [0, 0, 16], sizes = [2, 8, 8], strides = [1, 1, 1]} : vector<2x8x32xf32> to vector<2x8x8xf32>
    %105 = vector.extract_strided_slice %68 {offsets = [0, 0, 16], sizes = [2, 8, 8], strides = [1, 1, 1]} : vector<2x8x32xf32> to vector<2x8x8xf32>
    "tpu.trace_start"() <{level = 10 : i32, message = "bqd,bkd->bqk"}> : () -> ()
    %cst_40 = arith.constant dense<0.000000e+00> : vector<2x8x8xf32>
    %106 = tpu.matmul %103, %104, %cst_40 {dimension_numbers = #tpu.dot_dimension_numbers<[2], [2], [1], [1], [0, 0, 0, 1, 1, 1], [0], [0]>} : vector<2x8x8xf32>, vector<2x8x8xf32>, vector<2x8x8xf32> -> vector<2x8x8xf32>
    "tpu.trace_stop"() : () -> ()
    %107 = vector.broadcast %1 : vector<2x1x8xf32> to vector<2x8x8xf32>
    %108 = arith.addf %106, %107 : vector<2x8x8xf32>
    %cst_41 = arith.constant dense<0xFF800000> : vector<2x8xf32>
    %109 = vector.multi_reduction <maximumf>, %108, %cst_41 [2] : vector<2x8x8xf32> to vector<2x8xf32>
    %110 = vector.shape_cast %109 : vector<2x8xf32> to vector<2x8x1xf32>
    %111 = vector.broadcast %110 : vector<2x8x1xf32> to vector<2x8x8xf32>
    %112 = arith.subf %108, %111 : vector<2x8x8xf32>
    %113 = math.exp %112 : vector<2x8x8xf32>
    %cst_42 = arith.constant dense<0.000000e+00> : vector<2x8xf32>
    %114 = vector.multi_reduction <add>, %113, %cst_42 [2] : vector<2x8x8xf32> to vector<2x8xf32>
    %115 = vector.shape_cast %114 : vector<2x8xf32> to vector<2x8x1xf32>
    %116 = tpu.reciprocal %115 {approx = true} : vector<2x8x1xf32> -> vector<2x8x1xf32>
    %117 = vector.broadcast %116 : vector<2x8x1xf32> to vector<2x8x8xf32>
    %118 = arith.mulf %113, %117 : vector<2x8x8xf32>
    "tpu.trace_start"() <{level = 10 : i32, message = "bqk,bkd->bqd"}> : () -> ()
    %cst_43 = arith.constant dense<0.000000e+00> : vector<2x8x8xf32>
    %119 = tpu.matmul %118, %105, %cst_43 {dimension_numbers = #tpu.dot_dimension_numbers<[2], [1], [1], [2], [0, 0, 0, 1, 1, 2], [0], [0]>} : vector<2x8x8xf32>, vector<2x8x8xf32>, vector<2x8x8xf32> -> vector<2x8x8xf32>
    "tpu.trace_stop"() : () -> ()
    %120 = vector.extract_strided_slice %66 {offsets = [0, 0, 24], sizes = [2, 8, 8], strides = [1, 1, 1]} : vector<2x8x32xf32> to vector<2x8x8xf32>
    %121 = vector.extract_strided_slice %67 {offsets = [0, 0, 24], sizes = [2, 8, 8], strides = [1, 1, 1]} : vector<2x8x32xf32> to vector<2x8x8xf32>
    %122 = vector.extract_strided_slice %68 {offsets = [0, 0, 24], sizes = [2, 8, 8], strides = [1, 1, 1]} : vector<2x8x32xf32> to vector<2x8x8xf32>
    "tpu.trace_start"() <{level = 10 : i32, message = "bqd,bkd->bqk"}> : () -> ()
    %cst_44 = arith.constant dense<0.000000e+00> : vector<2x8x8xf32>
    %123 = tpu.matmul %120, %121, %cst_44 {dimension_numbers = #tpu.dot_dimension_numbers<[2], [2], [1], [1], [0, 0, 0, 1, 1, 1], [0], [0]>} : vector<2x8x8xf32>, vector<2x8x8xf32>, vector<2x8x8xf32> -> vector<2x8x8xf32>
    "tpu.trace_stop"() : () -> ()
    %124 = vector.broadcast %1 : vector<2x1x8xf32> to vector<2x8x8xf32>
    %125 = arith.addf %123, %124 : vector<2x8x8xf32>
    %cst_45 = arith.constant dense<0xFF800000> : vector<2x8xf32>
    %126 = vector.multi_reduction <maximumf>, %125, %cst_45 [2] : vector<2x8x8xf32> to vector<2x8xf32>
    %127 = vector.shape_cast %126 : vector<2x8xf32> to vector<2x8x1xf32>
    %128 = vector.broadcast %127 : vector<2x8x1xf32> to vector<2x8x8xf32>
    %129 = arith.subf %125, %128 : vector<2x8x8xf32>
    %130 = math.exp %129 : vector<2x8x8xf32>
    %cst_46 = arith.constant dense<0.000000e+00> : vector<2x8xf32>
    %131 = vector.multi_reduction <add>, %130, %cst_46 [2] : vector<2x8x8xf32> to vector<2x8xf32>
    %132 = vector.shape_cast %131 : vector<2x8xf32> to vector<2x8x1xf32>
    %133 = tpu.reciprocal %132 {approx = true} : vector<2x8x1xf32> -> vector<2x8x1xf32>
    %134 = vector.broadcast %133 : vector<2x8x1xf32> to vector<2x8x8xf32>
    %135 = arith.mulf %130, %134 : vector<2x8x8xf32>
    "tpu.trace_start"() <{level = 10 : i32, message = "bqk,bkd->bqd"}> : () -> ()
    %cst_47 = arith.constant dense<0.000000e+00> : vector<2x8x8xf32>
    %136 = tpu.matmul %135, %122, %cst_47 {dimension_numbers = #tpu.dot_dimension_numbers<[2], [1], [1], [2], [0, 0, 0, 1, 1, 2], [0], [0]>} : vector<2x8x8xf32>, vector<2x8x8xf32>, vector<2x8x8xf32> -> vector<2x8x8xf32>
    "tpu.trace_stop"() : () -> ()
    %137 = tpu.concatenate %85, %102, %119, %136 in 2 : vector<2x8x8xf32>, vector<2x8x8xf32>, vector<2x8x8xf32>, vector<2x8x8xf32> -> vector<2x8x32xf32>
    %138 = vector.shape_cast %137 : vector<2x8x32xf32> to vector<16x32xf32>
    %c0_48 = arith.constant 0 : index
    %c0_49 = arith.constant 0 : index
    %c0_50 = arith.constant 0 : index
    %139 = vector.load %arg6[%c0_48, %c0_49, %c0_50] : memref<2x32x32xf32, #tpu.memory_space<vmem>>, vector<1x32x32xf32>
    %140 = vector.shape_cast %139 : vector<1x32x32xf32> to vector<32x32xf32>
    %cst_51 = arith.constant dense<0.000000e+00> : vector<16x32xf32>
    %141 = tpu.matmul %138, %140, %cst_51 {dimension_numbers = #tpu.dot_dimension_numbers<[1], [0], [0], [1], [0, 0, 1, 1], [], []>} : vector<16x32xf32>, vector<32x32xf32>, vector<16x32xf32> -> vector<16x32xf32>
    %c0_52 = arith.constant 0 : index
    %c0_53 = arith.constant 0 : index
    %c0_54 = arith.constant 0 : index
    %142 = vector.load %arg7[%c0_52, %c0_53, %c0_54] : memref<2x1x32xf32, #tpu.memory_space<vmem>>, vector<1x1x32xf32>
    %143 = vector.shape_cast %142 : vector<1x1x32xf32> to vector<1x32xf32>
    %144 = vector.broadcast %143 : vector<1x32xf32> to vector<16x32xf32>
    %145 = arith.addf %141, %144 : vector<16x32xf32>
    %146 = arith.addf %27, %145 : vector<16x32xf32>
    %c2 = arith.constant 2 : index
    %c0_55 = arith.constant 0 : index
    %c0_56 = arith.constant 0 : index
    %147 = vector.load %arg8[%c2, %c0_55, %c0_56] : memref<8x1x32xf32, #tpu.memory_space<vmem>>, vector<1x1x32xf32>
    %148 = vector.shape_cast %147 : vector<1x1x32xf32> to vector<1x32xf32>
    %c3 = arith.constant 3 : index
    %c0_57 = arith.constant 0 : index
    %c0_58 = arith.constant 0 : index
    %149 = vector.load %arg8[%c3, %c0_57, %c0_58] : memref<8x1x32xf32, #tpu.memory_space<vmem>>, vector<1x1x32xf32>
    %150 = vector.shape_cast %149 : vector<1x1x32xf32> to vector<1x32xf32>
    %cst_59 = arith.constant dense<0.000000e+00> : vector<16xf32>
    %151 = vector.multi_reduction <add>, %146, %cst_59 [1] : vector<16x32xf32> to vector<16xf32>
    %152 = vector.shape_cast %151 : vector<16xf32> to vector<16x1xf32>
    %cst_60 = arith.constant 3.200000e+01 : f32
    %153 = vector.broadcast %cst_60 : f32 to vector<16x1xf32>
    %154 = arith.divf %152, %153 : vector<16x1xf32>
    %155 = vector.broadcast %154 : vector<16x1xf32> to vector<16x32xf32>
    %156 = arith.subf %146, %155 : vector<16x32xf32>
    %157 = arith.mulf %156, %156 : vector<16x32xf32>
    %cst_61 = arith.constant dense<0.000000e+00> : vector<16xf32>
    %158 = vector.multi_reduction <add>, %157, %cst_61 [1] : vector<16x32xf32> to vector<16xf32>
    %159 = vector.shape_cast %158 : vector<16xf32> to vector<16x1xf32>
    %cst_62 = arith.constant 3.200000e+01 : f32
    %160 = vector.broadcast %cst_62 : f32 to vector<16x1xf32>
    %161 = arith.divf %159, %160 : vector<16x1xf32>
    %162 = vector.broadcast %154 : vector<16x1xf32> to vector<16x32xf32>
    %163 = arith.subf %146, %162 : vector<16x32xf32>
    %cst_63 = arith.constant 9.99999974E-6 : f32
    %164 = vector.broadcast %cst_63 : f32 to vector<16x1xf32>
    %165 = arith.addf %161, %164 : vector<16x1xf32>
    %166 = math.rsqrt %165 : vector<16x1xf32>
    %167 = vector.broadcast %166 : vector<16x1xf32> to vector<16x32xf32>
    %168 = arith.mulf %163, %167 : vector<16x32xf32>
    %169 = vector.broadcast %148 : vector<1x32xf32> to vector<16x32xf32>
    %170 = arith.mulf %168, %169 : vector<16x32xf32>
    %171 = vector.broadcast %150 : vector<1x32xf32> to vector<16x32xf32>
    %172 = arith.addf %170, %171 : vector<16x32xf32>
    %c0_64 = arith.constant 0 : index
    %c0_65 = arith.constant 0 : index
    %c0_66 = arith.constant 0 : index
    %173 = vector.load %arg9[%c0_64, %c0_65, %c0_66] : memref<2x32x64xf32, #tpu.memory_space<vmem>>, vector<1x32x64xf32>
    %174 = vector.shape_cast %173 : vector<1x32x64xf32> to vector<32x64xf32>
    %cst_67 = arith.constant dense<0.000000e+00> : vector<16x64xf32>
    %175 = tpu.matmul %172, %174, %cst_67 {dimension_numbers = #tpu.dot_dimension_numbers<[1], [0], [0], [1], [0, 0, 1, 1], [], []>} : vector<16x32xf32>, vector<32x64xf32>, vector<16x64xf32> -> vector<16x64xf32>
    %c0_68 = arith.constant 0 : index
    %c0_69 = arith.constant 0 : index
    %c0_70 = arith.constant 0 : index
    %176 = vector.load %arg10[%c0_68, %c0_69, %c0_70] : memref<2x1x64xf32, #tpu.memory_space<vmem>>, vector<1x1x64xf32>
    %177 = vector.shape_cast %176 : vector<1x1x64xf32> to vector<1x64xf32>
    %178 = vector.broadcast %177 : vector<1x64xf32> to vector<16x64xf32>
    %179 = arith.addf %175, %178 : vector<16x64xf32>
    %180 = arith.mulf %179, %179 : vector<16x64xf32>
    %181 = arith.mulf %179, %180 : vector<16x64xf32>
    %cst_71 = arith.constant 4.471500e-02 : f32
    %182 = vector.broadcast %cst_71 : f32 to vector<16x64xf32>
    %183 = arith.mulf %182, %181 : vector<16x64xf32>
    %184 = arith.addf %179, %183 : vector<16x64xf32>
    %cst_72 = arith.constant 0.797884583 : f32
    %185 = vector.broadcast %cst_72 : f32 to vector<16x64xf32>
    %186 = arith.mulf %185, %184 : vector<16x64xf32>
    %187 = math.tanh %186 : vector<16x64xf32>
    %cst_73 = arith.constant 1.000000e+00 : f32
    %188 = vector.broadcast %cst_73 : f32 to vector<16x64xf32>
    %189 = arith.addf %188, %187 : vector<16x64xf32>
    %cst_74 = arith.constant 5.000000e-01 : f32
    %190 = vector.broadcast %cst_74 : f32 to vector<16x64xf32>
    %191 = arith.mulf %190, %189 : vector<16x64xf32>
    %192 = arith.mulf %179, %191 : vector<16x64xf32>
    %c0_75 = arith.constant 0 : index
    %c0_76 = arith.constant 0 : index
    %c0_77 = arith.constant 0 : index
    %193 = vector.load %arg11[%c0_75, %c0_76, %c0_77] : memref<2x64x32xf32, #tpu.memory_space<vmem>>, vector<1x64x32xf32>
    %194 = vector.shape_cast %193 : vector<1x64x32xf32> to vector<64x32xf32>
    %cst_78 = arith.constant dense<0.000000e+00> : vector<16x32xf32>
    %195 = tpu.matmul %192, %194, %cst_78 {dimension_numbers = #tpu.dot_dimension_numbers<[1], [0], [0], [1], [0, 0, 1, 1], [], []>} : vector<16x64xf32>, vector<64x32xf32>, vector<16x32xf32> -> vector<16x32xf32>
    %c0_79 = arith.constant 0 : index
    %c0_80 = arith.constant 0 : index
    %c0_81 = arith.constant 0 : index
    %196 = vector.load %arg12[%c0_79, %c0_80, %c0_81] : memref<2x1x32xf32, #tpu.memory_space<vmem>>, vector<1x1x32xf32>
    %197 = vector.shape_cast %196 : vector<1x1x32xf32> to vector<1x32xf32>
    %198 = vector.broadcast %197 : vector<1x32xf32> to vector<16x32xf32>
    %199 = arith.addf %195, %198 : vector<16x32xf32>
    %200 = arith.addf %146, %199 : vector<16x32xf32>
    %c4 = arith.constant 4 : index
    %c0_82 = arith.constant 0 : index
    %c0_83 = arith.constant 0 : index
    %201 = vector.load %arg8[%c4, %c0_82, %c0_83] : memref<8x1x32xf32, #tpu.memory_space<vmem>>, vector<1x1x32xf32>
    %202 = vector.shape_cast %201 : vector<1x1x32xf32> to vector<1x32xf32>
    %c5 = arith.constant 5 : index
    %c0_84 = arith.constant 0 : index
    %c0_85 = arith.constant 0 : index
    %203 = vector.load %arg8[%c5, %c0_84, %c0_85] : memref<8x1x32xf32, #tpu.memory_space<vmem>>, vector<1x1x32xf32>
    %204 = vector.shape_cast %203 : vector<1x1x32xf32> to vector<1x32xf32>
    %cst_86 = arith.constant dense<0.000000e+00> : vector<16xf32>
    %205 = vector.multi_reduction <add>, %200, %cst_86 [1] : vector<16x32xf32> to vector<16xf32>
    %206 = vector.shape_cast %205 : vector<16xf32> to vector<16x1xf32>
    %cst_87 = arith.constant 3.200000e+01 : f32
    %207 = vector.broadcast %cst_87 : f32 to vector<16x1xf32>
    %208 = arith.divf %206, %207 : vector<16x1xf32>
    %209 = vector.broadcast %208 : vector<16x1xf32> to vector<16x32xf32>
    %210 = arith.subf %200, %209 : vector<16x32xf32>
    %211 = arith.mulf %210, %210 : vector<16x32xf32>
    %cst_88 = arith.constant dense<0.000000e+00> : vector<16xf32>
    %212 = vector.multi_reduction <add>, %211, %cst_88 [1] : vector<16x32xf32> to vector<16xf32>
    %213 = vector.shape_cast %212 : vector<16xf32> to vector<16x1xf32>
    %cst_89 = arith.constant 3.200000e+01 : f32
    %214 = vector.broadcast %cst_89 : f32 to vector<16x1xf32>
    %215 = arith.divf %213, %214 : vector<16x1xf32>
    %216 = vector.broadcast %208 : vector<16x1xf32> to vector<16x32xf32>
    %217 = arith.subf %200, %216 : vector<16x32xf32>
    %cst_90 = arith.constant 9.99999974E-6 : f32
    %218 = vector.broadcast %cst_90 : f32 to vector<16x1xf32>
    %219 = arith.addf %215, %218 : vector<16x1xf32>
    %220 = math.rsqrt %219 : vector<16x1xf32>
    %221 = vector.broadcast %220 : vector<16x1xf32> to vector<16x32xf32>
    %222 = arith.mulf %217, %221 : vector<16x32xf32>
    %223 = vector.broadcast %202 : vector<1x32xf32> to vector<16x32xf32>
    %224 = arith.mulf %222, %223 : vector<16x32xf32>
    %225 = vector.broadcast %204 : vector<1x32xf32> to vector<16x32xf32>
    %226 = arith.addf %224, %225 : vector<16x32xf32>
    %c1_91 = arith.constant 1 : index
    %c0_92 = arith.constant 0 : index
    %c0_93 = arith.constant 0 : index
    %227 = vector.load %arg4[%c1_91, %c0_92, %c0_93] : memref<2x32x96xf32, #tpu.memory_space<vmem>>, vector<1x32x96xf32>
    %228 = vector.shape_cast %227 : vector<1x32x96xf32> to vector<32x96xf32>
    %cst_94 = arith.constant dense<0.000000e+00> : vector<16x96xf32>
    %229 = tpu.matmul %226, %228, %cst_94 {dimension_numbers = #tpu.dot_dimension_numbers<[1], [0], [0], [1], [0, 0, 1, 1], [], []>} : vector<16x32xf32>, vector<32x96xf32>, vector<16x96xf32> -> vector<16x96xf32>
    %c1_95 = arith.constant 1 : index
    %c0_96 = arith.constant 0 : index
    %c0_97 = arith.constant 0 : index
    %230 = vector.load %arg5[%c1_95, %c0_96, %c0_97] : memref<2x1x96xf32, #tpu.memory_space<vmem>>, vector<1x1x96xf32>
    %231 = vector.shape_cast %230 : vector<1x1x96xf32> to vector<1x96xf32>
    %232 = vector.broadcast %231 : vector<1x96xf32> to vector<16x96xf32>
    %233 = arith.addf %229, %232 : vector<16x96xf32>
    %234 = vector.extract_strided_slice %233 {offsets = [0, 0], sizes = [16, 32], strides = [1, 1]} : vector<16x96xf32> to vector<16x32xf32>
    %cst_98 = arith.constant 0.353553385 : f32
    %235 = vector.broadcast %cst_98 : f32 to vector<16x32xf32>
    %236 = arith.mulf %234, %235 : vector<16x32xf32>
    %237 = vector.extract_strided_slice %233 {offsets = [0, 32], sizes = [16, 32], strides = [1, 1]} : vector<16x96xf32> to vector<16x32xf32>
    %238 = vector.extract_strided_slice %233 {offsets = [0, 64], sizes = [16, 32], strides = [1, 1]} : vector<16x96xf32> to vector<16x32xf32>
    %239 = vector.shape_cast %236 : vector<16x32xf32> to vector<2x8x32xf32>
    %240 = vector.shape_cast %237 : vector<16x32xf32> to vector<2x8x32xf32>
    %241 = vector.shape_cast %238 : vector<16x32xf32> to vector<2x8x32xf32>
    %242 = vector.extract_strided_slice %239 {offsets = [0, 0, 0], sizes = [2, 8, 8], strides = [1, 1, 1]} : vector<2x8x32xf32> to vector<2x8x8xf32>
    %243 = vector.extract_strided_slice %240 {offsets = [0, 0, 0], sizes = [2, 8, 8], strides = [1, 1, 1]} : vector<2x8x32xf32> to vector<2x8x8xf32>
    %244 = vector.extract_strided_slice %241 {offsets = [0, 0, 0], sizes = [2, 8, 8], strides = [1, 1, 1]} : vector<2x8x32xf32> to vector<2x8x8xf32>
    "tpu.trace_start"() <{level = 10 : i32, message = "bqd,bkd->bqk"}> : () -> ()
    %cst_99 = arith.constant dense<0.000000e+00> : vector<2x8x8xf32>
    %245 = tpu.matmul %242, %243, %cst_99 {dimension_numbers = #tpu.dot_dimension_numbers<[2], [2], [1], [1], [0, 0, 0, 1, 1, 1], [0], [0]>} : vector<2x8x8xf32>, vector<2x8x8xf32>, vector<2x8x8xf32> -> vector<2x8x8xf32>
    "tpu.trace_stop"() : () -> ()
    %246 = vector.broadcast %1 : vector<2x1x8xf32> to vector<2x8x8xf32>
    %247 = arith.addf %245, %246 : vector<2x8x8xf32>
    %cst_100 = arith.constant dense<0xFF800000> : vector<2x8xf32>
    %248 = vector.multi_reduction <maximumf>, %247, %cst_100 [2] : vector<2x8x8xf32> to vector<2x8xf32>
    %249 = vector.shape_cast %248 : vector<2x8xf32> to vector<2x8x1xf32>
    %250 = vector.broadcast %249 : vector<2x8x1xf32> to vector<2x8x8xf32>
    %251 = arith.subf %247, %250 : vector<2x8x8xf32>
    %252 = math.exp %251 : vector<2x8x8xf32>
    %cst_101 = arith.constant dense<0.000000e+00> : vector<2x8xf32>
    %253 = vector.multi_reduction <add>, %252, %cst_101 [2] : vector<2x8x8xf32> to vector<2x8xf32>
    %254 = vector.shape_cast %253 : vector<2x8xf32> to vector<2x8x1xf32>
    %255 = tpu.reciprocal %254 {approx = true} : vector<2x8x1xf32> -> vector<2x8x1xf32>
    %256 = vector.broadcast %255 : vector<2x8x1xf32> to vector<2x8x8xf32>
    %257 = arith.mulf %252, %256 : vector<2x8x8xf32>
    "tpu.trace_start"() <{level = 10 : i32, message = "bqk,bkd->bqd"}> : () -> ()
    %cst_102 = arith.constant dense<0.000000e+00> : vector<2x8x8xf32>
    %258 = tpu.matmul %257, %244, %cst_102 {dimension_numbers = #tpu.dot_dimension_numbers<[2], [1], [1], [2], [0, 0, 0, 1, 1, 2], [0], [0]>} : vector<2x8x8xf32>, vector<2x8x8xf32>, vector<2x8x8xf32> -> vector<2x8x8xf32>
    "tpu.trace_stop"() : () -> ()
    %259 = vector.extract_strided_slice %239 {offsets = [0, 0, 8], sizes = [2, 8, 8], strides = [1, 1, 1]} : vector<2x8x32xf32> to vector<2x8x8xf32>
    %260 = vector.extract_strided_slice %240 {offsets = [0, 0, 8], sizes = [2, 8, 8], strides = [1, 1, 1]} : vector<2x8x32xf32> to vector<2x8x8xf32>
    %261 = vector.extract_strided_slice %241 {offsets = [0, 0, 8], sizes = [2, 8, 8], strides = [1, 1, 1]} : vector<2x8x32xf32> to vector<2x8x8xf32>
    "tpu.trace_start"() <{level = 10 : i32, message = "bqd,bkd->bqk"}> : () -> ()
    %cst_103 = arith.constant dense<0.000000e+00> : vector<2x8x8xf32>
    %262 = tpu.matmul %259, %260, %cst_103 {dimension_numbers = #tpu.dot_dimension_numbers<[2], [2], [1], [1], [0, 0, 0, 1, 1, 1], [0], [0]>} : vector<2x8x8xf32>, vector<2x8x8xf32>, vector<2x8x8xf32> -> vector<2x8x8xf32>
    "tpu.trace_stop"() : () -> ()
    %263 = vector.broadcast %1 : vector<2x1x8xf32> to vector<2x8x8xf32>
    %264 = arith.addf %262, %263 : vector<2x8x8xf32>
    %cst_104 = arith.constant dense<0xFF800000> : vector<2x8xf32>
    %265 = vector.multi_reduction <maximumf>, %264, %cst_104 [2] : vector<2x8x8xf32> to vector<2x8xf32>
    %266 = vector.shape_cast %265 : vector<2x8xf32> to vector<2x8x1xf32>
    %267 = vector.broadcast %266 : vector<2x8x1xf32> to vector<2x8x8xf32>
    %268 = arith.subf %264, %267 : vector<2x8x8xf32>
    %269 = math.exp %268 : vector<2x8x8xf32>
    %cst_105 = arith.constant dense<0.000000e+00> : vector<2x8xf32>
    %270 = vector.multi_reduction <add>, %269, %cst_105 [2] : vector<2x8x8xf32> to vector<2x8xf32>
    %271 = vector.shape_cast %270 : vector<2x8xf32> to vector<2x8x1xf32>
    %272 = tpu.reciprocal %271 {approx = true} : vector<2x8x1xf32> -> vector<2x8x1xf32>
    %273 = vector.broadcast %272 : vector<2x8x1xf32> to vector<2x8x8xf32>
    %274 = arith.mulf %269, %273 : vector<2x8x8xf32>
    "tpu.trace_start"() <{level = 10 : i32, message = "bqk,bkd->bqd"}> : () -> ()
    %cst_106 = arith.constant dense<0.000000e+00> : vector<2x8x8xf32>
    %275 = tpu.matmul %274, %261, %cst_106 {dimension_numbers = #tpu.dot_dimension_numbers<[2], [1], [1], [2], [0, 0, 0, 1, 1, 2], [0], [0]>} : vector<2x8x8xf32>, vector<2x8x8xf32>, vector<2x8x8xf32> -> vector<2x8x8xf32>
    "tpu.trace_stop"() : () -> ()
    %276 = vector.extract_strided_slice %239 {offsets = [0, 0, 16], sizes = [2, 8, 8], strides = [1, 1, 1]} : vector<2x8x32xf32> to vector<2x8x8xf32>
    %277 = vector.extract_strided_slice %240 {offsets = [0, 0, 16], sizes = [2, 8, 8], strides = [1, 1, 1]} : vector<2x8x32xf32> to vector<2x8x8xf32>
    %278 = vector.extract_strided_slice %241 {offsets = [0, 0, 16], sizes = [2, 8, 8], strides = [1, 1, 1]} : vector<2x8x32xf32> to vector<2x8x8xf32>
    "tpu.trace_start"() <{level = 10 : i32, message = "bqd,bkd->bqk"}> : () -> ()
    %cst_107 = arith.constant dense<0.000000e+00> : vector<2x8x8xf32>
    %279 = tpu.matmul %276, %277, %cst_107 {dimension_numbers = #tpu.dot_dimension_numbers<[2], [2], [1], [1], [0, 0, 0, 1, 1, 1], [0], [0]>} : vector<2x8x8xf32>, vector<2x8x8xf32>, vector<2x8x8xf32> -> vector<2x8x8xf32>
    "tpu.trace_stop"() : () -> ()
    %280 = vector.broadcast %1 : vector<2x1x8xf32> to vector<2x8x8xf32>
    %281 = arith.addf %279, %280 : vector<2x8x8xf32>
    %cst_108 = arith.constant dense<0xFF800000> : vector<2x8xf32>
    %282 = vector.multi_reduction <maximumf>, %281, %cst_108 [2] : vector<2x8x8xf32> to vector<2x8xf32>
    %283 = vector.shape_cast %282 : vector<2x8xf32> to vector<2x8x1xf32>
    %284 = vector.broadcast %283 : vector<2x8x1xf32> to vector<2x8x8xf32>
    %285 = arith.subf %281, %284 : vector<2x8x8xf32>
    %286 = math.exp %285 : vector<2x8x8xf32>
    %cst_109 = arith.constant dense<0.000000e+00> : vector<2x8xf32>
    %287 = vector.multi_reduction <add>, %286, %cst_109 [2] : vector<2x8x8xf32> to vector<2x8xf32>
    %288 = vector.shape_cast %287 : vector<2x8xf32> to vector<2x8x1xf32>
    %289 = tpu.reciprocal %288 {approx = true} : vector<2x8x1xf32> -> vector<2x8x1xf32>
    %290 = vector.broadcast %289 : vector<2x8x1xf32> to vector<2x8x8xf32>
    %291 = arith.mulf %286, %290 : vector<2x8x8xf32>
    "tpu.trace_start"() <{level = 10 : i32, message = "bqk,bkd->bqd"}> : () -> ()
    %cst_110 = arith.constant dense<0.000000e+00> : vector<2x8x8xf32>
    %292 = tpu.matmul %291, %278, %cst_110 {dimension_numbers = #tpu.dot_dimension_numbers<[2], [1], [1], [2], [0, 0, 0, 1, 1, 2], [0], [0]>} : vector<2x8x8xf32>, vector<2x8x8xf32>, vector<2x8x8xf32> -> vector<2x8x8xf32>
    "tpu.trace_stop"() : () -> ()
    %293 = vector.extract_strided_slice %239 {offsets = [0, 0, 24], sizes = [2, 8, 8], strides = [1, 1, 1]} : vector<2x8x32xf32> to vector<2x8x8xf32>
    %294 = vector.extract_strided_slice %240 {offsets = [0, 0, 24], sizes = [2, 8, 8], strides = [1, 1, 1]} : vector<2x8x32xf32> to vector<2x8x8xf32>
    %295 = vector.extract_strided_slice %241 {offsets = [0, 0, 24], sizes = [2, 8, 8], strides = [1, 1, 1]} : vector<2x8x32xf32> to vector<2x8x8xf32>
    "tpu.trace_start"() <{level = 10 : i32, message = "bqd,bkd->bqk"}> : () -> ()
    %cst_111 = arith.constant dense<0.000000e+00> : vector<2x8x8xf32>
    %296 = tpu.matmul %293, %294, %cst_111 {dimension_numbers = #tpu.dot_dimension_numbers<[2], [2], [1], [1], [0, 0, 0, 1, 1, 1], [0], [0]>} : vector<2x8x8xf32>, vector<2x8x8xf32>, vector<2x8x8xf32> -> vector<2x8x8xf32>
    "tpu.trace_stop"() : () -> ()
    %297 = vector.broadcast %1 : vector<2x1x8xf32> to vector<2x8x8xf32>
    %298 = arith.addf %296, %297 : vector<2x8x8xf32>
    %cst_112 = arith.constant dense<0xFF800000> : vector<2x8xf32>
    %299 = vector.multi_reduction <maximumf>, %298, %cst_112 [2] : vector<2x8x8xf32> to vector<2x8xf32>
    %300 = vector.shape_cast %299 : vector<2x8xf32> to vector<2x8x1xf32>
    %301 = vector.broadcast %300 : vector<2x8x1xf32> to vector<2x8x8xf32>
    %302 = arith.subf %298, %301 : vector<2x8x8xf32>
    %303 = math.exp %302 : vector<2x8x8xf32>
    %cst_113 = arith.constant dense<0.000000e+00> : vector<2x8xf32>
    %304 = vector.multi_reduction <add>, %303, %cst_113 [2] : vector<2x8x8xf32> to vector<2x8xf32>
    %305 = vector.shape_cast %304 : vector<2x8xf32> to vector<2x8x1xf32>
    %306 = tpu.reciprocal %305 {approx = true} : vector<2x8x1xf32> -> vector<2x8x1xf32>
    %307 = vector.broadcast %306 : vector<2x8x1xf32> to vector<2x8x8xf32>
    %308 = arith.mulf %303, %307 : vector<2x8x8xf32>
    "tpu.trace_start"() <{level = 10 : i32, message = "bqk,bkd->bqd"}> : () -> ()
    %cst_114 = arith.constant dense<0.000000e+00> : vector<2x8x8xf32>
    %309 = tpu.matmul %308, %295, %cst_114 {dimension_numbers = #tpu.dot_dimension_numbers<[2], [1], [1], [2], [0, 0, 0, 1, 1, 2], [0], [0]>} : vector<2x8x8xf32>, vector<2x8x8xf32>, vector<2x8x8xf32> -> vector<2x8x8xf32>
    "tpu.trace_stop"() : () -> ()
    %310 = tpu.concatenate %258, %275, %292, %309 in 2 : vector<2x8x8xf32>, vector<2x8x8xf32>, vector<2x8x8xf32>, vector<2x8x8xf32> -> vector<2x8x32xf32>
    %311 = vector.shape_cast %310 : vector<2x8x32xf32> to vector<16x32xf32>
    %c1_115 = arith.constant 1 : index
    %c0_116 = arith.constant 0 : index
    %c0_117 = arith.constant 0 : index
    %312 = vector.load %arg6[%c1_115, %c0_116, %c0_117] : memref<2x32x32xf32, #tpu.memory_space<vmem>>, vector<1x32x32xf32>
    %313 = vector.shape_cast %312 : vector<1x32x32xf32> to vector<32x32xf32>
    %cst_118 = arith.constant dense<0.000000e+00> : vector<16x32xf32>
    %314 = tpu.matmul %311, %313, %cst_118 {dimension_numbers = #tpu.dot_dimension_numbers<[1], [0], [0], [1], [0, 0, 1, 1], [], []>} : vector<16x32xf32>, vector<32x32xf32>, vector<16x32xf32> -> vector<16x32xf32>
    %c1_119 = arith.constant 1 : index
    %c0_120 = arith.constant 0 : index
    %c0_121 = arith.constant 0 : index
    %315 = vector.load %arg7[%c1_119, %c0_120, %c0_121] : memref<2x1x32xf32, #tpu.memory_space<vmem>>, vector<1x1x32xf32>
    %316 = vector.shape_cast %315 : vector<1x1x32xf32> to vector<1x32xf32>
    %317 = vector.broadcast %316 : vector<1x32xf32> to vector<16x32xf32>
    %318 = arith.addf %314, %317 : vector<16x32xf32>
    %319 = arith.addf %200, %318 : vector<16x32xf32>
    %c6 = arith.constant 6 : index
    %c0_122 = arith.constant 0 : index
    %c0_123 = arith.constant 0 : index
    %320 = vector.load %arg8[%c6, %c0_122, %c0_123] : memref<8x1x32xf32, #tpu.memory_space<vmem>>, vector<1x1x32xf32>
    %321 = vector.shape_cast %320 : vector<1x1x32xf32> to vector<1x32xf32>
    %c7 = arith.constant 7 : index
    %c0_124 = arith.constant 0 : index
    %c0_125 = arith.constant 0 : index
    %322 = vector.load %arg8[%c7, %c0_124, %c0_125] : memref<8x1x32xf32, #tpu.memory_space<vmem>>, vector<1x1x32xf32>
    %323 = vector.shape_cast %322 : vector<1x1x32xf32> to vector<1x32xf32>
    %cst_126 = arith.constant dense<0.000000e+00> : vector<16xf32>
    %324 = vector.multi_reduction <add>, %319, %cst_126 [1] : vector<16x32xf32> to vector<16xf32>
    %325 = vector.shape_cast %324 : vector<16xf32> to vector<16x1xf32>
    %cst_127 = arith.constant 3.200000e+01 : f32
    %326 = vector.broadcast %cst_127 : f32 to vector<16x1xf32>
    %327 = arith.divf %325, %326 : vector<16x1xf32>
    %328 = vector.broadcast %327 : vector<16x1xf32> to vector<16x32xf32>
    %329 = arith.subf %319, %328 : vector<16x32xf32>
    %330 = arith.mulf %329, %329 : vector<16x32xf32>
    %cst_128 = arith.constant dense<0.000000e+00> : vector<16xf32>
    %331 = vector.multi_reduction <add>, %330, %cst_128 [1] : vector<16x32xf32> to vector<16xf32>
    %332 = vector.shape_cast %331 : vector<16xf32> to vector<16x1xf32>
    %cst_129 = arith.constant 3.200000e+01 : f32
    %333 = vector.broadcast %cst_129 : f32 to vector<16x1xf32>
    %334 = arith.divf %332, %333 : vector<16x1xf32>
    %335 = vector.broadcast %327 : vector<16x1xf32> to vector<16x32xf32>
    %336 = arith.subf %319, %335 : vector<16x32xf32>
    %cst_130 = arith.constant 9.99999974E-6 : f32
    %337 = vector.broadcast %cst_130 : f32 to vector<16x1xf32>
    %338 = arith.addf %334, %337 : vector<16x1xf32>
    %339 = math.rsqrt %338 : vector<16x1xf32>
    %340 = vector.broadcast %339 : vector<16x1xf32> to vector<16x32xf32>
    %341 = arith.mulf %336, %340 : vector<16x32xf32>
    %342 = vector.broadcast %321 : vector<1x32xf32> to vector<16x32xf32>
    %343 = arith.mulf %341, %342 : vector<16x32xf32>
    %344 = vector.broadcast %323 : vector<1x32xf32> to vector<16x32xf32>
    %345 = arith.addf %343, %344 : vector<16x32xf32>
    %c1_131 = arith.constant 1 : index
    %c0_132 = arith.constant 0 : index
    %c0_133 = arith.constant 0 : index
    %346 = vector.load %arg9[%c1_131, %c0_132, %c0_133] : memref<2x32x64xf32, #tpu.memory_space<vmem>>, vector<1x32x64xf32>
    %347 = vector.shape_cast %346 : vector<1x32x64xf32> to vector<32x64xf32>
    %cst_134 = arith.constant dense<0.000000e+00> : vector<16x64xf32>
    %348 = tpu.matmul %345, %347, %cst_134 {dimension_numbers = #tpu.dot_dimension_numbers<[1], [0], [0], [1], [0, 0, 1, 1], [], []>} : vector<16x32xf32>, vector<32x64xf32>, vector<16x64xf32> -> vector<16x64xf32>
    %c1_135 = arith.constant 1 : index
    %c0_136 = arith.constant 0 : index
    %c0_137 = arith.constant 0 : index
    %349 = vector.load %arg10[%c1_135, %c0_136, %c0_137] : memref<2x1x64xf32, #tpu.memory_space<vmem>>, vector<1x1x64xf32>
    %350 = vector.shape_cast %349 : vector<1x1x64xf32> to vector<1x64xf32>
    %351 = vector.broadcast %350 : vector<1x64xf32> to vector<16x64xf32>
    %352 = arith.addf %348, %351 : vector<16x64xf32>
    %353 = arith.mulf %352, %352 : vector<16x64xf32>
    %354 = arith.mulf %352, %353 : vector<16x64xf32>
    %cst_138 = arith.constant 4.471500e-02 : f32
    %355 = vector.broadcast %cst_138 : f32 to vector<16x64xf32>
    %356 = arith.mulf %355, %354 : vector<16x64xf32>
    %357 = arith.addf %352, %356 : vector<16x64xf32>
    %cst_139 = arith.constant 0.797884583 : f32
    %358 = vector.broadcast %cst_139 : f32 to vector<16x64xf32>
    %359 = arith.mulf %358, %357 : vector<16x64xf32>
    %360 = math.tanh %359 : vector<16x64xf32>
    %cst_140 = arith.constant 1.000000e+00 : f32
    %361 = vector.broadcast %cst_140 : f32 to vector<16x64xf32>
    %362 = arith.addf %361, %360 : vector<16x64xf32>
    %cst_141 = arith.constant 5.000000e-01 : f32
    %363 = vector.broadcast %cst_141 : f32 to vector<16x64xf32>
    %364 = arith.mulf %363, %362 : vector<16x64xf32>
    %365 = arith.mulf %352, %364 : vector<16x64xf32>
    %c1_142 = arith.constant 1 : index
    %c0_143 = arith.constant 0 : index
    %c0_144 = arith.constant 0 : index
    %366 = vector.load %arg11[%c1_142, %c0_143, %c0_144] : memref<2x64x32xf32, #tpu.memory_space<vmem>>, vector<1x64x32xf32>
    %367 = vector.shape_cast %366 : vector<1x64x32xf32> to vector<64x32xf32>
    %cst_145 = arith.constant dense<0.000000e+00> : vector<16x32xf32>
    %368 = tpu.matmul %365, %367, %cst_145 {dimension_numbers = #tpu.dot_dimension_numbers<[1], [0], [0], [1], [0, 0, 1, 1], [], []>} : vector<16x64xf32>, vector<64x32xf32>, vector<16x32xf32> -> vector<16x32xf32>
    %c1_146 = arith.constant 1 : index
    %c0_147 = arith.constant 0 : index
    %c0_148 = arith.constant 0 : index
    %369 = vector.load %arg12[%c1_146, %c0_147, %c0_148] : memref<2x1x32xf32, #tpu.memory_space<vmem>>, vector<1x1x32xf32>
    %370 = vector.shape_cast %369 : vector<1x1x32xf32> to vector<1x32xf32>
    %371 = vector.broadcast %370 : vector<1x32xf32> to vector<16x32xf32>
    %372 = arith.addf %368, %371 : vector<16x32xf32>
    %373 = arith.addf %319, %372 : vector<16x32xf32>
    %c2_149 = arith.constant 2 : index
    %c0_150 = arith.constant 0 : index
    %c0_151 = arith.constant 0 : index
    %374 = vector.load %arg3[%c2_149, %c0_150, %c0_151] : memref<4x1x32xf32, #tpu.memory_space<vmem>>, vector<1x1x32xf32>
    %375 = vector.shape_cast %374 : vector<1x1x32xf32> to vector<1x32xf32>
    %c3_152 = arith.constant 3 : index
    %c0_153 = arith.constant 0 : index
    %c0_154 = arith.constant 0 : index
    %376 = vector.load %arg3[%c3_152, %c0_153, %c0_154] : memref<4x1x32xf32, #tpu.memory_space<vmem>>, vector<1x1x32xf32>
    %377 = vector.shape_cast %376 : vector<1x1x32xf32> to vector<1x32xf32>
    %cst_155 = arith.constant dense<0.000000e+00> : vector<16xf32>
    %378 = vector.multi_reduction <add>, %373, %cst_155 [1] : vector<16x32xf32> to vector<16xf32>
    %379 = vector.shape_cast %378 : vector<16xf32> to vector<16x1xf32>
    %cst_156 = arith.constant 3.200000e+01 : f32
    %380 = vector.broadcast %cst_156 : f32 to vector<16x1xf32>
    %381 = arith.divf %379, %380 : vector<16x1xf32>
    %382 = vector.broadcast %381 : vector<16x1xf32> to vector<16x32xf32>
    %383 = arith.subf %373, %382 : vector<16x32xf32>
    %384 = arith.mulf %383, %383 : vector<16x32xf32>
    %cst_157 = arith.constant dense<0.000000e+00> : vector<16xf32>
    %385 = vector.multi_reduction <add>, %384, %cst_157 [1] : vector<16x32xf32> to vector<16xf32>
    %386 = vector.shape_cast %385 : vector<16xf32> to vector<16x1xf32>
    %cst_158 = arith.constant 3.200000e+01 : f32
    %387 = vector.broadcast %cst_158 : f32 to vector<16x1xf32>
    %388 = arith.divf %386, %387 : vector<16x1xf32>
    %389 = vector.broadcast %381 : vector<16x1xf32> to vector<16x32xf32>
    %390 = arith.subf %373, %389 : vector<16x32xf32>
    %cst_159 = arith.constant 9.99999974E-6 : f32
    %391 = vector.broadcast %cst_159 : f32 to vector<16x1xf32>
    %392 = arith.addf %388, %391 : vector<16x1xf32>
    %393 = math.rsqrt %392 : vector<16x1xf32>
    %394 = vector.broadcast %393 : vector<16x1xf32> to vector<16x32xf32>
    %395 = arith.mulf %390, %394 : vector<16x32xf32>
    %396 = vector.broadcast %375 : vector<1x32xf32> to vector<16x32xf32>
    %397 = arith.mulf %395, %396 : vector<16x32xf32>
    %398 = vector.broadcast %377 : vector<1x32xf32> to vector<16x32xf32>
    %399 = arith.addf %397, %398 : vector<16x32xf32>
    %c0_160 = arith.constant 0 : index
    %c0_161 = arith.constant 0 : index
    %400 = vector.load %arg13[%c0_160, %c0_161] : memref<16x32xf32, #tpu.memory_space<vmem>>, vector<16x32xf32>
    tpu.vector_store %arg13[%c0_160, %c0_161], %399 {strides = array<i32>} : memref<16x32xf32, #tpu.memory_space<vmem>>, vector<16x32xf32>,
    return
  }
  func.func @transform_0(%arg0: i32) -> (i32, i32) {
    %c0_i32 = arith.constant 0 : i32
    %c0_i32_0 = arith.constant 0 : i32
    return %arg0, %c0_i32 : i32, i32
  }
  func.func @transform_1(%arg0: i32) -> (i32, i32, i32) {
    %c0_i32 = arith.constant 0 : i32
    %c0_i32_0 = arith.constant 0 : i32
    %c0_i32_1 = arith.constant 0 : i32
    return %arg0, %c0_i32, %c0_i32_0 : i32, i32, i32
  }
  func.func @transform_2(%arg0: i32) -> (i32, i32, i32) {
    %c0_i32 = arith.constant 0 : i32
    %c0_i32_0 = arith.constant 0 : i32
    %c0_i32_1 = arith.constant 0 : i32
    %c0_i32_2 = arith.constant 0 : i32
    return %c0_i32, %c0_i32_0, %c0_i32_1 : i32, i32, i32
  }
  func.func @transform_3(%arg0: i32) -> (i32, i32, i32) {
    %c0_i32 = arith.constant 0 : i32
    %c0_i32_0 = arith.constant 0 : i32
    %c0_i32_1 = arith.constant 0 : i32
    %c0_i32_2 = arith.constant 0 : i32
    return %c0_i32, %c0_i32_0, %c0_i32_1 : i32, i32, i32
  }
  func.func @transform_4(%arg0: i32) -> (i32, i32, i32) {
    %c0_i32 = arith.constant 0 : i32
    %c0_i32_0 = arith.constant 0 : i32
    %c0_i32_1 = arith.constant 0 : i32
    %c0_i32_2 = arith.constant 0 : i32
    return %c0_i32, %c0_i32_0, %c0_i32_1 : i32, i32, i32
  }
  func.func @transform_5(%arg0: i32) -> (i32, i32, i32) {
    %c0_i32 = arith.constant 0 : i32
    %c0_i32_0 = arith.constant 0 : i32
    %c0_i32_1 = arith.constant 0 : i32
    %c0_i32_2 = arith.constant 0 : i32
    return %c0_i32, %c0_i32_0, %c0_i32_1 : i32, i32, i32
  }
  func.func @transform_6(%arg0: i32) -> (i32, i32, i32) {
    %c0_i32 = arith.constant 0 : i32
    %c0_i32_0 = arith.constant 0 : i32
    %c0_i32_1 = arith.constant 0 : i32
    %c0_i32_2 = arith.constant 0 : i32
    return %c0_i32, %c0_i32_0, %c0_i32_1 : i32, i32, i32
  }
  func.func @transform_7(%arg0: i32) -> (i32, i32, i32) {
    %c0_i32 = arith.constant 0 : i32
    %c0_i32_0 = arith.constant 0 : i32
    %c0_i32_1 = arith.constant 0 : i32
    %c0_i32_2 = arith.constant 0 : i32
    return %c0_i32, %c0_i32_0, %c0_i32_1 : i32, i32, i32
  }
  func.func @transform_8(%arg0: i32) -> (i32, i32, i32) {
    %c0_i32 = arith.constant 0 : i32
    %c0_i32_0 = arith.constant 0 : i32
    %c0_i32_1 = arith.constant 0 : i32
    %c0_i32_2 = arith.constant 0 : i32
    return %c0_i32, %c0_i32_0, %c0_i32_1 : i32, i32, i32
  }
  func.func @transform_9(%arg0: i32) -> (i32, i32, i32) {
    %c0_i32 = arith.constant 0 : i32
    %c0_i32_0 = arith.constant 0 : i32
    %c0_i32_1 = arith.constant 0 : i32
    %c0_i32_2 = arith.constant 0 : i32
    return %c0_i32, %c0_i32_0, %c0_i32_1 : i32, i32, i32
  }
  func.func @transform_10(%arg0: i32) -> (i32, i32, i32) {
    %c0_i32 = arith.constant 0 : i32
    %c0_i32_0 = arith.constant 0 : i32
    %c0_i32_1 = arith.constant 0 : i32
    %c0_i32_2 = arith.constant 0 : i32
    return %c0_i32, %c0_i32_0, %c0_i32_1 : i32, i32, i32
  }
  func.func @transform_11(%arg0: i32) -> (i32, i32, i32) {
    %c0_i32 = arith.constant 0 : i32
    %c0_i32_0 = arith.constant 0 : i32
    %c0_i32_1 = arith.constant 0 : i32
    %c0_i32_2 = arith.constant 0 : i32
    return %c0_i32, %c0_i32_0, %c0_i32_1 : i32, i32, i32
  }
  func.func @transform_12(%arg0: i32) -> (i32, i32) {
    %c0_i32 = arith.constant 0 : i32
    %c0_i32_0 = arith.constant 0 : i32
    return %arg0, %c0_i32 : i32, i32
  }
}

</mosaic_0001>

<bundles_post_ra>
// kernel: tpu_custom_call.1
= control target key start
LH: loop header
LB: loop body
LE: loop exit
PB: predicated region body
PF: predicated region fallthrough
CT: control target
= control target key end

     0   :  { %s6318_s0 = inlined_call_operand.hbm [shape: f32[32,32], index: 0, kind: input, shape index: {}]   ;;  %s6319_s1 = inlined_call_operand.hbm [shape: f32[4,1,8], index: 1, kind: input, shape index: {}]   ;;  %s6320_s2 = inlined_call_operand.hbm [shape: f32[4,1,32], index: 2, kind: input, shape index: {}]   ;;  %s6321_s3 = inlined_call_operand.vmem [shape: f32[2,32,96], index: 3, kind: input, shape index: {}]   ;;  %s6322_s4 = inlined_call_operand.vmem [shape: f32[2,1,96], index: 4, kind: input, shape index: {}]   ;;  %s6323_s5 = inlined_call_operand.vmem [shape: f32[2,32,32], index: 5, kind: input, shape index: {}]   ;;  %s6324_s6 = inlined_call_operand.vmem [shape: f32[2,1,32], index: 6, kind: input, shape index: {}]   ;;  %s6325_s7 = inlined_call_operand.vmem [shape: f32[8,1,32], index: 7, kind: input, shape index: {}]   ;;  %s6326_s8 = inlined_call_operand.vmem [shape: f32[2,32,64], index: 8, kind: input, shape index: {}]   ;;  %s6327_s9 = inlined_call_operand.vmem [shape: f32[2,1,64], index: 9, kind: input, shape index: {}]   ;;  %s6328_s10 = inlined_call_operand.vmem [shape: f32[2,64,32], index: 10, kind: input, shape index: {}]   ;;  %s6329_s11 = inlined_call_operand.vmem [shape: f32[2,1,32], index: 11, kind: input, shape index: {}]   ;;  %s6330_s12 = inlined_call_operand.hbm [shape: f32[32,32], index: 12, kind: output, shape index: {}]  }
   0x1   :  { %6358 = sst [smem:[#allocation19_spill]] %s6318_s0 }
   0x2   :  { %6359 = sst [smem:[#allocation20_spill]] %s6320_s2 }
   0x3   :  { %6360 = sst [smem:[#allocation21_spill]] %s6329_s11 }
   0x4   :  { %6361 = sst [smem:[#allocation22_spill]] %s6330_s12 }
   0x5   :  { %17 = vsyncpa [#allocation3], 0 }
   0x6   :  { %19 = vsyncpa [#allocation3 + $0x1], 0 }
   0x7   :  { %20 = vsyncpa [#allocation6], 0 }
   0x8   :  { %22 = vsyncpa [#allocation6 + $0x1], 0 }
   0x9   :  { %23 = vsyncpa [#allocation4], 0 }
   0xa   :  { %25 = vsyncpa [#allocation4 + $0x1], 0  ;;  %s5445_s21 = smov 0   ;;  %s5447_s22 = smov 0  }
   0xb   :  { %s5449_s23 = smov 0   ;;  %s5451_s24 = smov 0  }
   0xc LB: > { %6362 = sst [smem:[#allocation13_spill]] %s5341_s21  ;;  %s5466_s25 = sadd.s32 4294967295, %s5353_s24   ;;  %s5353_s24 = sphi %s5451_s24, %s6398_s24   ;;  %s5349_s23 = sphi %s5449_s23, %s6400_s23   ;;  %s5345_s22 = sphi %s5447_s22, %s6402_s22   ;;  %s5341_s21 = sphi %s5445_s21, %s6401_s21  }
   0xd   : > { %6363 = sst [smem:[#allocation14_spill]] %s5349_s23  ;;  %s4406_s26 = sadd.s32 4294967294, %s5353_s24  }
   0xe   : > { %p51_p0 = scmp.ne.s32.totalorder %s5345_s22, %s5341_s21  ;;  %p6335_p1 = scmp.eq.s32.totalorder %s5466_s25, 0 }
   0xf   : > { %p317_p3 = scmp.eq.s32.totalorder %s4406_s26, 1  ;;  %p4407_p5 = scmp.ge.s32.totalorder %s5353_s24, 1 }
  0x10   : > { %p5475_p4 = por %p6335_p1, %p51_p0  ;;  %p324_p7 = scmp.lt.s32.totalorder %s5353_s24, 3 }
  0x11   : > { %p5480_p6 = por %p317_p3, %p51_p0  ;;  %s5355_s30 = smov [#allocation7]  }
  0x12   : > { %s6364_s27 = scalar_select %p5475_p4, 1, 0 }
  0x13   : > { %s6365_s28 = scalar_select %p5480_p6, 1, 0 }
  0x14   : > { %p5485_p8 = pnand %p4407_p5, %p324_p7  ;;  %s336_s13 = sshll.u32 %s5355_s30, 4  ;;  %s5489_s13 = int_to_ptr.vmem [resolvable:$true] %s336_s13 }
  0x15   : > { %6366 = sst [smem:[#allocation15_spill]] %s6365_s28  ;;  %s5501_s15 = sadd.s32 1, %s5353_s24  }
  0x16   : > { %s6367_s29 = scalar_select %p5485_p8, 1, 0 }
  0x17   : > { %p5020_p9 = pneg %p5485_p8  ;;  %6369 = sst [smem:[#allocation16_spill]] %s5501_s15 }
  0x18   : > { %s38_s16 = sadd.s32 1, %s5349_s23  ;;  %s35_s17 = ssub.s32 %s5353_s24, %s5501_s15 }
  0x19   : > { %p5496_p11 = pnand %p5020_p9, %p6335_p1  ;;  %s6370_s2 = sld [smem:[#allocation20_spill]] }
  0x1b   : > { %p5193_p13 = pneg %p5496_p11 }
  0x1f   : > { %s5191_s20 = scalar_lea.hbm %s6370_s2, 64 }
  0x20   : > { %p5192_p12 = scmp.ne.s32.totalorder %s6370_s2, %s5191_s20  ;;  %p5198_p5 = scmp.lt.u32.totalorder %s5191_s20, %s6370_s2 }
  0x22   : > { %p5194_p0 = pnand %p5193_p13, %p5192_p12 }
  0x24   : > { %p5195_p3 = pneg %p5194_p0 }
  0x26   : > { %p5200_p7 = pnand %p5198_p5, %p5195_p3 }
  0x28   : > { %5203 = shalt.err (!%p5200_p7)
}
  0x29   : > { %s5204_s15 = scalar_lea.vmem %s5489_s13, 64  ;;  %p5212_p2 = scmp.lt.s32.totalorder %s5489_s13, %s5489_s13 }
  0x2a   : > { %p5205_p9 = scmp.ne.s32.totalorder %s5489_s13, %s5204_s15  ;;  %p5213_p6 = scmp.lt.s32.totalorder %s5204_s15, %s5204_s15 }
  0x2c   : > { %p5207_p10 = pnand %p5205_p9, %p5193_p13  ;;  %p5214_p4 = por %p5213_p6, %p5212_p2 }
  0x2e   : > { %p5208_p1 = pneg %p5207_p10 }
  0x30   : > { %p5215_p8 = pnand %p5214_p4, %p5208_p1 }
  0x32   : > { %5218 = shalt.err (!%p5215_p8)
}
  0x33   : > { %s6338_s18 = smov 16   ;;  %s6339_s21 = smov 1  }
  0x34   : > { %5023 = dma.hbm_to_vmem [thread:$0]  (!%p5496_p11), %s6370_s2, 64, %s5489_s13, [#allocation6], %s6338_s18, %s6338_s18, %s6339_s21  }
  0x35   : > { %p36_p1 = scmp.eq.s32.totalorder %s35_s17, 0  ;;  %p45_p2 = scmp.ne.s32.totalorder %s5349_s23, %s5345_s22 }
  0x36   : > { %p46_p4 = scmp.eq.s32.totalorder %s5353_s24, 0  ;;  %p5036_p6 = scmp.lt.s32.totalorder %s5353_s24, 2 }
  0x37   : > { %s5535_s19 = scalar_select %p36_p1, %s5349_s23, %s38_s16  }
  0x38   : > { %p47_p8 = por %p46_p4, %p45_p2  ;;  %p6372_p10 = scmp.eq.s32.totalorder %s5466_s25, 1 }
  0x39   : > { %6371 = sst [smem:[#allocation17_spill]] %s5535_s19  ;;  %s5544_s14 = sand.u32 1, %s5349_s23  }
  0x3a   : > { %p5539_p12 = por %p6372_p10, %p45_p2  ;;  %s4543_s26 = sshll.u32 %s5353_s24, 8 }
  0x3b   : > { %s4410_s30 = sshll.u32 %s5544_s14, 4  ;;  %s6375_s0 = sld [smem:[#allocation19_spill]] }
  0x3c   : > { %s6373_s20 = scalar_select %p5539_p12, 1, 0 }
  0x3d   : > { %s381_s16 = scalar_lea.vmem [#allocation2], %s4410_s30  ;;  %p5553_p11 = pnand %p5036_p6, %p47_p8 }
  0x3e   : > { %6374 = sst [smem:[#allocation18_spill]] %s6373_s20  ;;  %s388_s15 = sshll.u32 %s381_s16, 4  ;;  %s5557_s15 = int_to_ptr.vmem [resolvable:$true] %s388_s15 }
  0x3f   : > { %p5221_p0 = pneg %p5553_p11 }
  0x41   : > { %s5551_s17 = scalar_lea.hbm %s6375_s0, %s4543_s26  ;;  %s5224_s28 = scalar_lea.hbm %s6375_s0, 512 }
  0x42   : > { %s5219_s2 = scalar_lea.hbm %s5551_s17, 256  ;;  %p5225_p7 = scmp.lt.u32.totalorder %s5551_s17, %s6375_s0 }
  0x43   : > { %p5220_p13 = scmp.ne.s32.totalorder %s5551_s17, %s5219_s2  ;;  %p5226_p9 = scmp.lt.u32.totalorder %s5224_s28, %s5219_s2 }
  0x44   : > { %p5228_p2 = scmp.lt.u32.totalorder %s5219_s2, %s5551_s17 }
  0x45   : > { %p5222_p3 = pnand %p5221_p0, %p5220_p13  ;;  %p5227_p1 = por %p5226_p9, %p5225_p7 }
  0x47   : > { %p5223_p5 = pneg %p5222_p3  ;;  %p5229_p4 = por %p5228_p2, %p5227_p1 }
  0x49   : > { %p5230_p6 = pnand %p5229_p4, %p5223_p5 }
  0x4b   : > { %5233 = shalt.err (!%p5230_p6)
}
  0x4c   : > { %s5234_s21 = scalar_lea.vmem %s5557_s15, 256  ;;  %s5358_s26 = smov [#allocation2]  }
  0x4d   : > { %p5235_p8 = scmp.ne.s32.totalorder %s5557_s15, %s5234_s21  ;;  %s5239_s30 = sshll.u32 %s5358_s26, 4  ;;  %s5240_s30 = int_to_ptr.vmem [resolvable:$false] %s5239_s30 }
  0x4e   : > { %s5241_s13 = scalar_lea.vmem %s5240_s30, 512  ;;  %p5242_p3 = scmp.lt.s32.totalorder %s5557_s15, %s5240_s30 }
  0x4f   : > { %p5237_p10 = pnand %p5235_p8, %p5221_p0  ;;  %p5243_p7 = scmp.lt.s32.totalorder %s5241_s13, %s5234_s21 }
  0x51   : > { %p5238_p13 = pneg %p5237_p10  ;;  %p5244_p9 = por %p5243_p7, %p5242_p3 }
  0x53   : > { %p5245_p1 = pnand %p5244_p9, %p5238_p13 }
  0x55   : > { %5248 = shalt.err (!%p5245_p1)
}
  0x56   : > { %s5359_s2 = smov 128   ;;  %s5360_s28 = smov 8  }
  0x57   : > { %s6377_s16 = scalar_lea.sflag [#allocation3], %s5544_s14  ;;  %s398_s26 = sand.u32 1, %s5353_s24  }
  0x58   : > { %5027 = dma.hbm_to_vmem [thread:$0]  (!%p5553_p11), %s5551_s17, 256, %s5557_s15, %s6377_s16, %s5359_s2, %s5359_s2, %s5360_s28  }
  0x59   : > { %s4413_s0 = sshll.u32 %s5544_s14, 1  ;;  %s4544_s30 = sshll.u32 %s5353_s24, 5 }
  0x5a   : > { %s402_s21 = scalar_lea.vmem [#allocation5], %s4413_s0  ;;  %s5593_s12 = scalar_lea.hbm %s6319_s1, %s4544_s30 }
  0x5b   : > { %s409_s13 = sshll.u32 %s402_s21, 4  ;;  %s5597_s20 = scalar_lea.sflag [#allocation6], %s398_s26  ;;  %s5595_s13 = int_to_ptr.vmem [resolvable:$true] %s409_s13 }
  0x5c   : > { %s5249_s11 = scalar_lea.hbm %s5593_s12, 32  ;;  %s5254_s23 = scalar_lea.hbm %s6319_s1, 64 }
  0x5d   : > { %p5250_p5 = scmp.ne.s32.totalorder %s5593_s12, %s5249_s11  ;;  %p5255_p6 = scmp.lt.u32.totalorder %s5593_s12, %s6319_s1 }
  0x5e   : > { %p5256_p8 = scmp.lt.u32.totalorder %s5254_s23, %s5249_s11  ;;  %p5258_p13 = scmp.lt.u32.totalorder %s5249_s11, %s5593_s12 }
  0x5f   : > { %p5252_p2 = pnand %p5250_p5, %p5221_p0 }
  0x60   : > { %p5257_p10 = por %p5256_p8, %p5255_p6 }
  0x61   : > { %p5253_p4 = pneg %p5252_p2 }
  0x62   : > { %p5259_p3 = por %p5258_p13, %p5257_p10 }
  0x64   : > { %p5260_p7 = pnand %p5259_p3, %p5253_p4 }
  0x66   : > { %5263 = shalt.err (!%p5260_p7)
}
  0x67   : > { %s5264_s15 = scalar_lea.vmem %s5595_s13, 32  ;;  %s5361_s2 = smov [#allocation5]  }
  0x68   : > { %p5265_p9 = scmp.ne.s32.totalorder %s5595_s13, %s5264_s15  ;;  %s5269_s28 = sshll.u32 %s5361_s2, 4  ;;  %s5270_s28 = int_to_ptr.vmem [resolvable:$false] %s5269_s28 }
  0x69   : > { %s5271_s16 = scalar_lea.vmem %s5270_s28, 64  ;;  %p5272_p2 = scmp.lt.s32.totalorder %s5595_s13, %s5270_s28 }
  0x6a   : > { %p5267_p1 = pnand %p5265_p9, %p5221_p0  ;;  %p5273_p6 = scmp.lt.s32.totalorder %s5271_s16, %s5264_s15 }
  0x6c   : > { %p5268_p5 = pneg %p5267_p1  ;;  %p5274_p8 = por %p5273_p6, %p5272_p2 }
  0x6e   : > { %p5275_p10 = pnand %p5274_p8, %p5268_p5 }
  0x70   : > { %5278 = shalt.err (!%p5275_p10)
}
  0x71   : > { %s6378_s11 = smov 1   ;;  %s6379_s26 = smov 16  }
  0x72   : > { %5030 = dma.hbm_to_vmem [thread:$0]  (!%p5553_p11), %s5593_s12, 32, %s5595_s13, %s5597_s20, %s6379_s26, %s6379_s26, %s6378_s11  }
  0x73   : > { %p6380_p0 = scmp.ne.s32.totalorder %s6367_s29, 0 }
  0x74   : > { %s5629_s30 = sand.u32 (!%p6380_p0), 1, %s5345_s22   ;;  %p6381_p4 = scmp.ne.s32.totalorder (!%p6380_p0), %s6364_s27, 0 }
  0x75   : > { %421 = sbr.rel (%p6380_p0) target bundleno = 8970 (0x230a), region = 68  ;;  %s6345_s21 = sshll.u32 (!%p6380_p0), %s5629_s30, 4 }
  0x76   : > { %s424_s0 = scalar_lea.sflag (!%p6380_p0), [#allocation3], %s5629_s30  ;;  %s427_s18 = scalar_lea.vmem (!%p6380_p0), [#allocation2], %s6345_s21 }
  0x7c   : > { %5324 = dma.done.wait (%p6381_p4), %s424_s0, 256  }
  0x7d   : > { %5326 = vsyncadd (%p6381_p4), %s424_s0, 4294967040  ;;  %s432_s12 = sand.u32 1, %s5466_s25   ;;  %s4418_s29 = sshll.u32 %s5629_s30, 1 }
  0x7e   : > { %s433_s20 = scalar_lea.sflag [#allocation6], %s432_s12  ;;  %s5641_s13 = scalar_lea.vmem [#allocation5], %s4418_s29 }
  0x7f   : > { %5328 = dma.done.wait (%p6381_p4), %s433_s20, 32  }
  0x80   : > { %5330 = vsyncadd (%p6381_p4), %s433_s20, 4294967264  ;;  %p6382_p11 = scmp.eq.s32.totalorder %s5466_s25, 0 }
  0x82   : > { %5332 = dma.done.wait (%p6382_p11), [#allocation6], 64   ;;  %p6383_p13 = pmov %p6382_p11 }
  0x83   : > { %vm496_vm0 = vcmask 261120   ;;  %v489_v0 = vld [vmem:[%s427_s18] sm:$0xff]  ;;  %v490_v1 = vld [vmem:[%s427_s18 + $0x8] sm:$0xff]  ;;  %vm5363_vm1 = vmmov 0   ;;  %s5364_s29 = smov 96   ;;  %vm694_vm2 = vcmask 64512  }
  0x84   : > { %5334 = vsyncadd (%p6383_p13), [#allocation6], 4294967232  ;;  %v497_v2 = vsel %vm496_vm0, %v489_v0, 0.0  ;;  %v500_v3 = vsel %vm496_vm0, %v490_v1, 0.0  ;;  %v4421_v21 = vld [vmem:[#allocation7] ss:$0 sm:$0xff] }
  0x85   : > { %498 = vadd.xlane.f32.xlu0 %v497_v2  ;;  %v4422_v23 = vld [vmem:[#allocation7 + $0x1] ss:$0 sm:$0xff]  ;;  %v586_v43 = vld [vmem:[%s6321_s3 + $0x8] sm:$0xff]  ;;  %v587_v44 = vld [vmem:[%s6321_s3 + $0x10] sm:$0xff]  ;;  %s5365_s20 = smov 64   ;;  %s5366_s27 = smov 88  }
  0x86   : > { %v585_v42 = vld [vmem:[%s6321_s3] sm:$0xff]  ;;  %v588_v46 = vld [vmem:[%s6321_s3 + $0x18] sm:$0xff]  ;;  %s5367_s14 = smov 120   ;;  %s5368_s23 = smov 56   ;;  %vm2041_vm3 = vcmask 195584   ;;  %vm2038_vm4 = vcmask 130048  }
  0x87   : > { %v4930_v45 = vpack.c.bf16 %v586_v43, %v585_v42  ;;  %v4934_v47 = vpack.c.bf16 %v588_v46, %v587_v44  ;;  %v4424_v55 = vld [vmem:[%s6325_s7] ss:$0 sm:$0xff]  ;;  %v4425_v57 = vld [vmem:[%s6325_s7 + $0x1] ss:$0 sm:$0xff]  ;;  %s5369_s19 = smov 80   ;;  %s5370_s17 = smov 112  }
  0x88   : > { %s5371_s15 = smov 48   ;;  %s6356_s2 = smov 72   ;;  %vm2309_vm5 = vcmask 523264  }
  0x89   : > { %501 = vadd.xlane.f32.xlu0 %v500_v3  ;;  %4931 = vmatprep.subr.bf16.mxu1 %v4930_v45  ;;  %s6352_s28 = smov 104   ;;  %s6350_s16 = smov 40  }
  0x8a   : > { %4933 = vmatpush3.bf16.msra.mxu1 %v4930_v45  ;;  %s6348_s11 = smov 8   ;;  %s6346_s26 = smov 16  }
  0x8b   : > { %4935 = vmatprep.subr.bf16.mxu1 %v4934_v47  ;;  %s6354_s0 = smov 24  }
  0x8e   : > { %4937 = vmatpush3.bf16.msra.mxu1 %v4934_v47 }
 0x112   : > { %v499_v4 = vpop.xlane.xlu0 %498 }
 0x113   : > { %v504_v5 = vmul.f32 0.03125, %v499_v4 }
 0x115   : > { %v506_v6 = vsub.f32 %v489_v0, %v504_v5  ;;  %v5362_v0 = vmov 0.0  }
 0x116   : > { %v502_v7 = vpop.xlane.xlu0 %501  ;;  %4677 = vmatprep.subr.mxu1 %v5362_v0  ;;  %4687 = vmatprep.subr.mxu0 %v5362_v0 }
 0x117   : > { %v505_v8 = vmul.f32 0.03125, %v502_v7  ;;  %v508_v9 = vmul.f32 %v506_v6, %v506_v6  ;;  %4689 = vmatprep.mubr.msk.f32.mxu0 %vm5363_vm1, %v5362_v0 }
 0x119   : > { %v507_v10 = vsub.f32 %v490_v1, %v505_v8  ;;  %v510_v11 = vsel %vm496_vm0, %v508_v9, 0.0  ;;  %v4426_v1 = vld [vmem:[%s6322_s4] ss:$0 sm:$0xff] }
 0x11a   : > { %511 = vadd.xlane.f32.xlu1 %v510_v11 }
 0x11b   : > { %v509_v12 = vmul.f32 %v507_v10, %v507_v10 }
 0x11d   : > { %v513_v13 = vsel %vm496_vm0, %v509_v12, 0.0 }
 0x11e   : > { %514 = vadd.xlane.f32.xlu1 %v513_v13 }
 0x1a7   : > { %v512_v14 = vpop.xlane.xlu1 %511 }
 0x1a8   : > { %v516_v15 = vmul.f32 0.03125, %v512_v14  ;;  %v5727_v14 = vld [vmem:[%s5641_s13 + $0x1] ss:$0 sm:$0xff] }
 0x1aa   : > { %v518_v16 = vadd.f32 1e-05, %v516_v15 }
 0x1ab   : > { %v515_v17 = vpop.xlane.xlu1 %514 }
 0x1ac   : > { %5093 = vrsqrt.f32 %v518_v16  ;;  %v517_v18 = vmul.f32 0.03125, %v515_v17 }
 0x1ae   : > { %v519_v19 = vadd.f32 1e-05, %v517_v18 }
 0x1b0   : > { %5095 = vrsqrt.f32 %v519_v19 }
 0x1b6   : > { %v5094_v20 = vpop.eup %5093 }
 0x1b7   : > { %v522_v22 = vmul.f32 %v5094_v20, %v506_v6 }
 0x1b9   : > { %v530_v24 = vmul.f32 %v4421_v21, %v522_v22 }
 0x1ba   : > { %v5096_v25 = vpop.eup %5095 }
 0x1bb   : > { %v5655_v26 = vadd.f32 %v4422_v23, %v530_v24  ;;  %v523_v27 = vmul.f32 %v5096_v25, %v507_v10  ;;  %v5723_v10 = vld [vmem:[%s5641_s13] ss:$0 sm:$0xff] }
 0x1bd   : > { %v543_v28 = vsel %vm496_vm0, %v5655_v26, 0.0  ;;  %v531_v29 = vmul.f32 %v4421_v21, %v523_v27 }
 0x1be   : > { %544 = vadd.xlane.f32.xlu0 %v543_v28 }
 0x1bf   : > { %v5659_v30 = vadd.f32 %v4422_v23, %v531_v29 }
 0x1c1   : > { %v546_v31 = vsel %vm496_vm0, %v5659_v30, 0.0 }
 0x1c2   : > { %547 = vadd.xlane.f32.xlu1 %v546_v31 }
 0x24b   : > { %v545_v32 = vpop.xlane.xlu0 %544 }
 0x24c   : > { %v549_v33 = vmul.f32 0.03125, %v545_v32 }
 0x24e   : > { %v551_v34 = vsub.f32 %v5655_v26, %v549_v33 }
 0x24f   : > { %v548_v35 = vpop.xlane.xlu1 %547 }
 0x250   : > { %v550_v36 = vmul.f32 0.03125, %v548_v35  ;;  %v553_v37 = vmul.f32 %v551_v34, %v551_v34 }
 0x252   : > { %v552_v38 = vsub.f32 %v5659_v30, %v550_v36  ;;  %v555_v39 = vsel %vm496_vm0, %v553_v37, 0.0 }
 0x253   : > { %556 = vadd.xlane.f32.xlu0 %v555_v39 }
 0x254   : > { %v554_v40 = vmul.f32 %v552_v38, %v552_v38 }
 0x256   : > { %v558_v41 = vsel %vm496_vm0, %v554_v40, 0.0 }
 0x257   : > { %559 = vadd.xlane.f32.xlu1 %v558_v41 }
 0x2e0   : > { %v557_v48 = vpop.xlane.xlu0 %556 }
 0x2e1   : > { %v561_v49 = vmul.f32 0.03125, %v557_v48 }
 0x2e3   : > { %v563_v50 = vadd.f32 1e-05, %v561_v49 }
 0x2e4   : > { %v560_v51 = vpop.xlane.xlu1 %559 }
 0x2e5   : > { %5097 = vrsqrt.f32 %v563_v50  ;;  %v562_v52 = vmul.f32 0.03125, %v560_v51 }
 0x2e7   : > { %v564_v53 = vadd.f32 1e-05, %v562_v52 }
 0x2e9   : > { %5099 = vrsqrt.f32 %v564_v53 }
 0x2ef   : > { %v5098_v54 = vpop.eup %5097 }
 0x2f0   : > { %v567_v56 = vmul.f32 %v5098_v54, %v551_v34 }
 0x2f2   : > { %v575_v58 = vmul.f32 %v4424_v55, %v567_v56 }
 0x2f3   : > { %v5100_v59 = vpop.eup %5099 }
 0x2f4   : > { %v568_v60 = vmul.f32 %v5100_v59, %v552_v38  ;;  %v583_v61 = vadd.f32 %v4425_v57, %v575_v58 }
 0x2f6   : > { %v576_v62 = vmul.f32 %v4424_v55, %v568_v60  ;;  %4674 = vmatprep.mubr.msk.f32.mxu1 %vm496_vm0, %v583_v61 }
 0x2f8   : > { %v584_v63 = vadd.f32 %v4425_v57, %v576_v62 }
 0x2fa   : > { %4675 = vmatmul.mubr.msk.f32.vlgmr.msra.gmra.mrb[0].mxu1 %vm496_vm0, %v584_v63 }
 0x2fb   : > { %4679 = vmatprep.mubr.msk.f32.mxu1 %vm5363_vm1, %v5362_v0 }
 0x3cd   : > { %v4676_v2 = vpop.f32.mrb[0].mxu1 }
 0x3ce   : > { %v5696_v3 = vadd.f32 %v4676_v2, %v4426_v1  ;;  %v668_v4 = vpop.f32.mrb[1].mxu1 }
 0x3cf   : > { %v5698_v5 = vadd.f32 %v4426_v1, %v668_v4 }
 0x3d0   : > { %771 = vrot.lane.b32.xlu1 %v5696_v3, %s5364_s29  ;;  %v5715_v9 = vmul.f32 0.35355338, %v5696_v3 }
 0x3d1   : > { %692 = vrot.lane.b32.xlu0 %v5698_v5, %s5364_s29  ;;  %v5706_v7 = vmul.f32 0.35355338, %v5698_v5 }
 0x442   : > { %v772_v8 = vpop.permute.xlu1 %771 }
 0x443   : > { %v693_v6 = vpop.permute.xlu0 %692 }
 0x444   : > { %4678 = vmatpush3.xpose.msk.msra.mxu1 %vm694_vm2, %v693_v6 }
 0x445   : > { %4682 = vmatprep.subr.mxu1 %v5362_v0 }
 0x447   : > { %4680 = vmatmul.mubr.msk.f32.vlgmr.msra.gmra.mrb[2].mxu1 %vm694_vm2, %v5706_v7 }
 0x448   : > { %4683 = vmatpush3.xpose.msk.msra.mxu1 %vm694_vm2, %v772_v8  ;;  %4684 = vmatprep.mubr.msk.f32.mxu1 %vm5363_vm1, %v5362_v0 }
 0x449   : > { %4692 = vmatprep.subr.mxu1 %v5362_v0 }
 0x44b   : > { %4685 = vmatmul.mubr.msk.f32.vlgmr.msra.gmra.mrb[4].mxu1 %vm694_vm2, %v5715_v9 }
 0x44c   : > { %4694 = vmatprep.mubr.msk.f32.mxu1 %vm5363_vm1, %v5362_v0 }
 0x51a   : > { %v766_v11 = vpop.f32.mrb[2].mxu1 }
 0x51b   : > { %v767_v12 = vadd.f32 %v5723_v10, %v766_v11  ;;  %v4681_v13 = vpop.f32.mrb[3].mxu1 }
 0x51d   : > { %v848_v15 = vsel %vm694_vm2, %v767_v12, -inf }
 0x51e   : > { %849 = vmax.xlane.f32.xlu1 %v848_v15  ;;  %v844_v16 = vpop.f32.mrb[4].mxu1 }
 0x51f   : > { %v845_v17 = vadd.f32 %v5727_v14, %v844_v16  ;;  %v4686_v18 = vpop.f32.mrb[5].mxu1 }
 0x521   : > { %v851_v19 = vsel %vm694_vm2, %v845_v17, -inf }
 0x522   : > { %852 = vmax.xlane.f32.xlu0 %v851_v19 }
 0x52f   : > { %946 = vrot.lane.b32.xlu1 %v5696_v3, %s5365_s20 }
 0x533   : > { %1024 = vrot.lane.b32.xlu1 %v5698_v5, %s5366_s27 }
 0x537   : > { %1102 = vrot.lane.b32.xlu1 %v5696_v3, %s5366_s27 }
 0x538   : > { %870 = vrot.lane.b32.xlu0 %v5698_v5, %s5365_s20 }
 0x5ab   : > { %v850_v20 = vpop.xlane.xlu1 %849 }
 0x5ac   : > { %v854_v21 = vsub.f32 %v767_v12, %v850_v20 }
 0x5ae   : > { %v856_v22 = vmul.f32 1.442695, %v854_v21 }
 0x5af   : > { %v947_v23 = vpop.permute.xlu1 %946  ;;  %v853_v24 = vpop.xlane.xlu0 %852 }
 0x5b0   : > { %5101 = vpow2.f32 %v856_v22  ;;  %v855_v25 = vsub.f32 %v845_v17, %v853_v24  ;;  %4693 = vmatpush3.msra.mxu1 %v947_v23 }
 0x5b1   : > { %4702 = vmatprep.subr.mxu1 %v5362_v0 }
 0x5b2   : > { %v858_v27 = vmul.f32 1.442695, %v855_v25 }
 0x5b3   : > { %v871_v28 = vpop.permute.xlu0 %870  ;;  %v1025_v34 = vpop.permute.xlu1 %1024 }
 0x5b4   : > { %5103 = vpow2.f32 %v858_v27  ;;  %4688 = vmatpush3.msra.mxu0 %v871_v28 }
 0x5b5   : > { %4697 = vmatprep.subr.mxu0 %v5362_v0 }
 0x5b7   : > { %v1103_v35 = vpop.permute.xlu1 %1102 }
 0x5ba   : > { %v5102_v29 = vpop.eup %5101 }
 0x5bb   : > { %v860_v31 = vsel %vm694_vm2, %v5102_v29, 0.0 }
 0x5bc   : > { %861 = vadd.xlane.f32.xlu0 %v860_v31 }
 0x5be   : > { %v5104_v32 = vpop.eup %5103 }
 0x5bf   : > { %v863_v33 = vsel %vm694_vm2, %v5104_v32, 0.0 }
 0x5c0   : > { %864 = vadd.xlane.f32.xlu1 %v863_v33 }
 0x5d1   : > { %1100 = vrot.lane.b32.xlu1 %v5715_v9, %s5367_s14 }
 0x5d2   : > { %1022 = vrot.lane.b32.xlu0 %v5706_v7, %s5367_s14 }
 0x649   : > { %v862_v36 = vpop.xlane.xlu0 %861 }
 0x64a   : > { %5105 = vrcp.f32 %v862_v36 }
 0x64d   : > { %v865_v37 = vpop.xlane.xlu1 %864  ;;  %v1023_v42 = vpop.permute.xlu0 %1022 }
 0x64e   : > { %5107 = vrcp.f32 %v865_v37 }
 0x651   : > { %v1101_v43 = vpop.permute.xlu1 %1100 }
 0x654   : > { %v5106_v38 = vpop.eup %5105 }
 0x655   : > { %v868_v39 = vmul.f32 %v5106_v38, %v5102_v29 }
 0x657   : > { %4690 = vmatmul.mubr.msk.f32.vlgmr.msra.gmra.mrb[0].mxu0 %vm694_vm2, %v868_v39 }
 0x658   : > { %v5108_v40 = vpop.eup %5107  ;;  %4698 = vmatpush3.xpose.msk.msra.mxu0 %vm694_vm2, %v1025_v34  ;;  %4699 = vmatprep.mubr.msk.f32.mxu0 %vm5363_vm1, %v5362_v0 }
 0x659   : > { %v869_v41 = vmul.f32 %v5108_v40, %v5104_v32  ;;  %4707 = vmatprep.subr.mxu0 %v5362_v0 }
 0x65b   : > { %4695 = vmatmul.mubr.msk.f32.vlgmr.msra.gmra.mrb[6].mxu1 %vm694_vm2, %v869_v41  ;;  %4700 = vmatmul.mubr.msk.f32.vlgmr.msra.gmra.mrb[2].mxu0 %vm694_vm2, %v1023_v42 }
 0x65c   : > { %4703 = vmatpush3.xpose.msk.msra.mxu1 %vm694_vm2, %v1103_v35  ;;  %4704 = vmatprep.mubr.msk.f32.mxu1 %vm5363_vm1, %v5362_v0 }
 0x65d   : > { %4712 = vmatprep.subr.mxu1 %v5362_v0  ;;  %4709 = vmatprep.mubr.msk.f32.mxu0 %vm5363_vm1, %v5362_v0 }
 0x65f   : > { %4705 = vmatmul.mubr.msk.f32.vlgmr.msra.gmra.mrb[8].mxu1 %vm694_vm2, %v1101_v43 }
 0x660   : > { %4714 = vmatprep.mubr.msk.f32.mxu1 %vm5363_vm1, %v5362_v0 }
 0x72a   : > { %v5764_v44 = vpop.f32.mrb[0].mxu0 }
 0x72b   : > { %v4691_v45 = vpop.f32.mrb[1].mxu0 }
 0x72e   : > { %v5766_v46 = vpop.f32.mrb[6].mxu1  ;;  %v1096_v47 = vpop.f32.mrb[2].mxu0 }
 0x72f   : > { %v1097_v48 = vadd.f32 %v5723_v10, %v1096_v47  ;;  %v4696_v49 = vpop.f32.mrb[7].mxu1  ;;  %v4701_v50 = vpop.f32.mrb[3].mxu0 }
 0x731   : > { %v1178_v51 = vsel %vm694_vm2, %v1097_v48, -inf }
 0x732   : > { %1179 = vmax.xlane.f32.xlu0 %v1178_v51  ;;  %v1174_v52 = vpop.f32.mrb[8].mxu1 }
 0x733   : > { %v1175_v53 = vadd.f32 %v5727_v14, %v1174_v52  ;;  %v4706_v54 = vpop.f32.mrb[9].mxu1 }
 0x735   : > { %v1181_v55 = vsel %vm694_vm2, %v1175_v53, -inf }
 0x736   : > { %1182 = vmax.xlane.f32.xlu1 %v1181_v55 }
 0x747   : > { %1276 = vrot.lane.b32.xlu1 %v5696_v3, %s5368_s23 }
 0x748   : > { %1200 = vrot.lane.b32.xlu0 %v5698_v5, %s5368_s23 }
 0x74b   : > { %1354 = vrot.lane.b32.xlu1 %v5698_v5, %s5369_s19 }
 0x74f   : > { %1432 = vrot.lane.b32.xlu1 %v5696_v3, %s5369_s19 }
 0x753   : > { %1430 = vrot.lane.b32.xlu1 %v5715_v9, %s5370_s17 }
 0x7bf   : > { %v1180_v56 = vpop.xlane.xlu0 %1179 }
 0x7c0   : > { %v1184_v57 = vsub.f32 %v1097_v48, %v1180_v56 }
 0x7c2   : > { %v1186_v58 = vmul.f32 1.442695, %v1184_v57 }
 0x7c3   : > { %v1201_v59 = vpop.permute.xlu0 %1200  ;;  %v1183_v60 = vpop.xlane.xlu1 %1182 }
 0x7c4   : > { %5109 = vpow2.f32 %v1186_v58  ;;  %v1185_v61 = vsub.f32 %v1175_v53, %v1183_v60  ;;  %4708 = vmatpush3.msra.mxu0 %v1201_v59 }
 0x7c5   : > { %4717 = vmatprep.subr.mxu0 %v5362_v0 }
 0x7c6   : > { %v1188_v62 = vmul.f32 1.442695, %v1185_v61 }
 0x7c7   : > { %v1277_v63 = vpop.permute.xlu1 %1276 }
 0x7c8   : > { %5111 = vpow2.f32 %v1188_v62  ;;  %4713 = vmatpush3.msra.mxu1 %v1277_v63 }
 0x7c9   : > { %4722 = vmatprep.subr.mxu1 %v5362_v0 }
 0x7cb   : > { %v1355_v12 = vpop.permute.xlu1 %1354 }
 0x7ce   : > { %v5110_v1 = vpop.eup %5109 }
 0x7cf   : > { %v1190_v2 = vsel %vm694_vm2, %v5110_v1, 0.0  ;;  %v1433_v17 = vpop.permute.xlu1 %1432 }
 0x7d0   : > { %1191 = vadd.xlane.f32.xlu0 %v1190_v2 }
 0x7d2   : > { %v5112_v4 = vpop.eup %5111 }
 0x7d3   : > { %v1193_v6 = vsel %vm694_vm2, %v5112_v4, 0.0  ;;  %v1431_v20 = vpop.permute.xlu1 %1430 }
 0x7d4   : > { %1194 = vadd.xlane.f32.xlu0 %v1193_v6 }
 0x7ea   : > { %1352 = vrot.lane.b32.xlu0 %v5706_v7, %s5370_s17 }
 0x85d   : > { %v1192_v8 = vpop.xlane.xlu0 %1191 }
 0x85e   : > { %5113 = vrcp.f32 %v1192_v8 }
 0x861   : > { %v1195_v11 = vpop.xlane.xlu0 %1194 }
 0x862   : > { %5115 = vrcp.f32 %v1195_v11 }
 0x865   : > { %v1353_v19 = vpop.permute.xlu0 %1352 }
 0x868   : > { %v5114_v13 = vpop.eup %5113 }
 0x869   : > { %v1198_v15 = vmul.f32 %v5114_v13, %v5110_v1 }
 0x86b   : > { %4710 = vmatmul.mubr.msk.f32.vlgmr.msra.gmra.mrb[4].mxu0 %vm694_vm2, %v1198_v15 }
 0x86c   : > { %v5116_v16 = vpop.eup %5115  ;;  %4718 = vmatpush3.xpose.msk.msra.mxu0 %vm694_vm2, %v1355_v12  ;;  %4719 = vmatprep.mubr.msk.f32.mxu0 %vm5363_vm1, %v5362_v0 }
 0x86d   : > { %v1199_v18 = vmul.f32 %v5116_v16, %v5112_v4  ;;  %4727 = vmatprep.subr.mxu0 %v5362_v0 }
 0x86f   : > { %4715 = vmatmul.mubr.msk.f32.vlgmr.msra.gmra.mrb[10].mxu1 %vm694_vm2, %v1199_v18  ;;  %4720 = vmatmul.mubr.msk.f32.vlgmr.msra.gmra.mrb[6].mxu0 %vm694_vm2, %v1353_v19 }
 0x870   : > { %4723 = vmatpush3.xpose.msk.msra.mxu1 %vm694_vm2, %v1433_v17  ;;  %4724 = vmatprep.mubr.msk.f32.mxu1 %vm5363_vm1, %v5362_v0 }
 0x871   : > { %4732 = vmatprep.subr.mxu1 %v5362_v0  ;;  %4729 = vmatprep.mubr.msk.f32.mxu0 %vm5363_vm1, %v5362_v0 }
 0x873   : > { %4725 = vmatmul.mubr.msk.f32.vlgmr.msra.gmra.mrb[12].mxu1 %vm694_vm2, %v1431_v20 }
 0x874   : > { %4734 = vmatprep.mubr.msk.f32.mxu1 %vm5363_vm1, %v5362_v0 }
 0x93e   : > { %v5804_v21 = vpop.f32.mrb[4].mxu0 }
 0x93f   : > { %v4711_v22 = vpop.f32.mrb[5].mxu0 }
 0x942   : > { %v5806_v23 = vpop.f32.mrb[10].mxu1  ;;  %v1426_v24 = vpop.f32.mrb[6].mxu0 }
 0x943   : > { %v1427_v25 = vadd.f32 %v5723_v10, %v1426_v24  ;;  %v4716_v27 = vpop.f32.mrb[11].mxu1  ;;  %v4721_v28 = vpop.f32.mrb[7].mxu0 }
 0x945   : > { %v1508_v29 = vsel %vm694_vm2, %v1427_v25, -inf }
 0x946   : > { %1509 = vmax.xlane.f32.xlu0 %v1508_v29  ;;  %v1504_v31 = vpop.f32.mrb[12].mxu1 }
 0x947   : > { %v1505_v32 = vadd.f32 %v5727_v14, %v1504_v31  ;;  %v4726_v33 = vpop.f32.mrb[13].mxu1  ;;  %v2045_v31 = vld [vmem:[%s6323_s5 + $0x8] sm:$0xff] }
 0x948   : > { %v2046_v33 = vld [vmem:[%s6323_s5 + $0x10] sm:$0xff] }
 0x949   : > { %v1511_v34 = vsel %vm694_vm2, %v1505_v32, -inf }
 0x94a   : > { %1512 = vmax.xlane.f32.xlu1 %v1511_v34  ;;  %v2047_v34 = vld [vmem:[%s6323_s5 + $0x18] sm:$0xff] }
 0x95b   : > { %1606 = vrot.lane.b32.xlu1 %v5696_v3, %s5371_s15 }
 0x95c   : > { %1530 = vrot.lane.b32.xlu0 %v5698_v5, %s5371_s15 }
 0x95f   : > { %1684 = vrot.lane.b32.xlu1 %v5698_v5, %s6356_s2 }
 0x963   : > { %1762 = vrot.lane.b32.xlu1 %v5696_v3, %s6356_s2  ;;  %s6390_s2 = smov 24  }
 0x967   : > { %1760 = vrot.lane.b32.xlu1 %v5715_v9, %s6352_s28 }
 0x9d3   : > { %v1510_v35 = vpop.xlane.xlu0 %1509 }
 0x9d4   : > { %v1514_v36 = vsub.f32 %v1427_v25, %v1510_v35  ;;  %v4942_v35 = vpack.c.bf16 %v2047_v34, %v2046_v33  ;;  %v2295_v33 = vld [vmem:[%s6328_s10 + $0x8] sm:$0xff] }
 0x9d6   : > { %v1516_v37 = vmul.f32 1.442695, %v1514_v36 }
 0x9d7   : > { %v1531_v38 = vpop.permute.xlu0 %1530  ;;  %v1513_v39 = vpop.xlane.xlu1 %1512 }
 0x9d8   : > { %5117 = vpow2.f32 %v1516_v37  ;;  %v1515_v40 = vsub.f32 %v1505_v32, %v1513_v39  ;;  %4728 = vmatpush3.msra.mxu0 %v1531_v38 }
 0x9d9   : > { %4737 = vmatprep.subr.mxu0 %v5362_v0 }
 0x9da   : > { %v1518_v41 = vmul.f32 1.442695, %v1515_v40 }
 0x9db   : > { %v1607_v42 = vpop.permute.xlu1 %1606 }
 0x9dc   : > { %5119 = vpow2.f32 %v1518_v41  ;;  %4733 = vmatpush3.msra.mxu1 %v1607_v42 }
 0x9dd   : > { %4742 = vmatprep.subr.mxu1 %v5362_v0 }
 0x9df   : > { %v1685_v50 = vpop.permute.xlu1 %1684 }
 0x9e2   : > { %v5118_v43 = vpop.eup %5117 }
 0x9e3   : > { %v1520_v45 = vsel %vm694_vm2, %v5118_v43, 0.0  ;;  %v1763_v54 = vpop.permute.xlu1 %1762 }
 0x9e4   : > { %1521 = vadd.xlane.f32.xlu0 %v1520_v45 }
 0x9e6   : > { %v5120_v9 = vpop.eup %5119 }
 0x9e7   : > { %v1523_v47 = vsel %vm694_vm2, %v5120_v9, 0.0  ;;  %v1761_v56 = vpop.permute.xlu1 %1760 }
 0x9e8   : > { %1524 = vadd.xlane.f32.xlu0 %v1523_v47 }
 0x9fe   : > { %1682 = vrot.lane.b32.xlu0 %v5706_v7, %s6352_s28  ;;  %s5378_s28 = smov [#allocation8]  }
 0xa71   : > { %v1522_v48 = vpop.xlane.xlu0 %1521 }
 0xa72   : > { %5121 = vrcp.f32 %v1522_v48 }
 0xa75   : > { %v1525_v49 = vpop.xlane.xlu0 %1524 }
 0xa76   : > { %5123 = vrcp.f32 %v1525_v49 }
 0xa79   : > { %v1683_v7 = vpop.permute.xlu0 %1682 }
 0xa7c   : > { %v5122_v51 = vpop.eup %5121 }
 0xa7d   : > { %v1528_v52 = vmul.f32 %v5122_v51, %v5118_v43 }
 0xa7f   : > { %4730 = vmatmul.mubr.msk.f32.vlgmr.msra.gmra.mrb[8].mxu0 %vm694_vm2, %v1528_v52 }
 0xa80   : > { %v5124_v53 = vpop.eup %5123  ;;  %4738 = vmatpush3.xpose.msk.msra.mxu0 %vm694_vm2, %v1685_v50  ;;  %4739 = vmatprep.mubr.msk.f32.mxu0 %vm5363_vm1, %v5362_v0 }
 0xa81   : > { %v1529_v55 = vmul.f32 %v5124_v53, %v5120_v9  ;;  %4747 = vmatprep.subr.mxu0 %v5362_v0 }
 0xa83   : > { %4735 = vmatmul.mubr.msk.f32.vlgmr.msra.gmra.mrb[14].mxu1 %vm694_vm2, %v1529_v55  ;;  %4740 = vmatmul.mubr.msk.f32.vlgmr.msra.gmra.mrb[10].mxu0 %vm694_vm2, %v1683_v7 }
 0xa84   : > { %4743 = vmatpush3.xpose.msk.msra.mxu1 %vm694_vm2, %v1763_v54  ;;  %4744 = vmatprep.mubr.msk.f32.mxu1 %vm5363_vm1, %v5362_v0 }
 0xa85   : > { %4752 = vmatprep.subr.mxu1 %v5362_v0  ;;  %4749 = vmatprep.mubr.msk.f32.mxu0 %vm5363_vm1, %v5362_v0 }
 0xa87   : > { %4745 = vmatmul.mubr.msk.f32.vlgmr.msra.gmra.mrb[16].mxu1 %vm694_vm2, %v1761_v56 }
 0xa88   : > { %4754 = vmatprep.mubr.msk.f32.mxu1 %vm5363_vm1, %v5362_v0 }
 0xb52   : > { %v1602_v57 = vpop.f32.mrb[8].mxu0 }
 0xb53   : > { %v4731_v58 = vpop.f32.mrb[9].mxu0 }
 0xb56   : > { %v1678_v59 = vpop.f32.mrb[14].mxu1  ;;  %v1756_v60 = vpop.f32.mrb[10].mxu0 }
 0xb57   : > { %v1757_v61 = vadd.f32 %v5723_v10, %v1756_v60  ;;  %v4736_v62 = vpop.f32.mrb[15].mxu1  ;;  %v4741_v63 = vpop.f32.mrb[11].mxu0 }
 0xb59   : > { %v1838_v1 = vsel %vm694_vm2, %v1757_v61, -inf }
 0xb5a   : > { %1839 = vmax.xlane.f32.xlu0 %v1838_v1  ;;  %v1834_v2 = vpop.f32.mrb[16].mxu1 }
 0xb5b   : > { %v1835_v4 = vadd.f32 %v5727_v14, %v1834_v2  ;;  %v4746_v6 = vpop.f32.mrb[17].mxu1 }
 0xb5c   : > { %v2184_v6 = vld [vmem:[%s6326_s8] sm:$0xff] }
 0xb5d   : > { %v1841_v8 = vsel %vm694_vm2, %v1835_v4, -inf }
 0xb5e   : > { %1842 = vmax.xlane.f32.xlu1 %v1841_v8  ;;  %v2185_v8 = vld [vmem:[%s6326_s8 + $0x8] sm:$0xff] }
 0xb6f   : > { %1936 = vrot.lane.b32.xlu1 %v5696_v3, %s6350_s16 }
 0xb73   : > { %2014 = vrot.lane.b32.xlu1 %v5804_v21, %s6348_s11 }
 0xb77   : > { %2016 = vrot.lane.b32.xlu1 %v5806_v23, %s6348_s11  ;;  %s5283_s11 = sshll.u32 %s5378_s28, 4  ;;  %s5284_s11 = int_to_ptr.vmem [resolvable:$false] %s5283_s11 }
 0xb7b   : > { %2024 = vrot.lane.b32.xlu1 %v1678_v59, %s6346_s26 }
 0xbe7   : > { %v1840_v11 = vpop.xlane.xlu0 %1839 }
 0xbe8   : > { %v1844_v12 = vsub.f32 %v1757_v61, %v1840_v11  ;;  %v4946_v11 = vpack.c.bf16 %v2185_v8, %v2184_v6 }
 0xbea   : > { %v1846_v13 = vmul.f32 1.442695, %v1844_v12  ;;  %v2186_v12 = vld [vmem:[%s6326_s8 + $0x10] sm:$0xff] }
 0xbeb   : > { %v1843_v15 = vpop.xlane.xlu1 %1842 }
 0xbec   : > { %5125 = vpow2.f32 %v1846_v13  ;;  %v1845_v16 = vsub.f32 %v1835_v4, %v1843_v15  ;;  %v2187_v13 = vld [vmem:[%s6326_s8 + $0x18] sm:$0xff] }
 0xbed   : > { %v4950_v15 = vpack.c.bf16 %v2187_v13, %v2186_v12 }
 0xbee   : > { %v1848_v17 = vmul.f32 1.442695, %v1845_v16 }
 0xbef   : > { %v1937_v18 = vpop.permute.xlu1 %1936 }
 0xbf0   : > { %5127 = vpow2.f32 %v1848_v17  ;;  %4753 = vmatpush3.msra.mxu1 %v1937_v18 }
 0xbf1   : > { %4947 = vmatprep.subr.bf16.mxu1 %v4946_v11 }
 0xbf3   : > { %v2015_v40 = vpop.permute.xlu1 %2014 }
 0xbf4   : > { %v2036_v43 = vsel %vm694_vm2, %v5764_v44, %v2015_v40  ;;  %v4455_v44 = vld [vmem:[%s6324_s6] ss:$0 sm:$0xff] }
 0xbf6   : > { %v5126_v3 = vpop.eup %5125 }
 0xbf7   : > { %v1850_v19 = vsel %vm694_vm2, %v5126_v3, 0.0  ;;  %v2017_v41 = vpop.permute.xlu1 %2016 }
 0xbf8   : > { %1851 = vadd.xlane.f32.xlu0 %v1850_v19  ;;  %v2037_v49 = vsel %vm694_vm2, %v5766_v46, %v2017_v41  ;;  %v2300_v41 = vld [vmem:[%s6328_s10 + $0x30] sm:$0xff] }
 0xbfa   : > { %v5128_v20 = vpop.eup %5127 }
 0xbfb   : > { %v1853_v21 = vsel %vm694_vm2, %v5128_v20, 0.0  ;;  %v2025_v45 = vpop.permute.xlu1 %2024 }
 0xbfc   : > { %1854 = vadd.xlane.f32.xlu0 %v1853_v21  ;;  %v2040_v50 = vsel %vm2038_vm4, %v2037_v49, %v2025_v45  ;;  %v4462_v45 = vld [vmem:[%s6327_s9] ss:$0 sm:$0xff] }
 0xc12   : > { %1860 = vrot.lane.b32.xlu0 %v5698_v5, %s6350_s16  ;;  %v2044_v5 = vld [vmem:[%s6323_s5] sm:$0xff]  ;;  %s6384_s16 = sld [smem:[#allocation21_spill]] }
 0xc13   : > { %v4938_v32 = vpack.c.bf16 %v2045_v31, %v2044_v5 }
 0xc16   : > { %2022 = vrot.lane.b32.xlu0 %v1602_v57, %s6346_s26  ;;  %s5285_s26 = scalar_lea.vmem %s5284_s11, 512 }
 0xc85   : > { %v1852_v22 = vpop.xlane.xlu0 %1851 }
 0xc86   : > { %5129 = vrcp.f32 %v1852_v22  ;;  %v4460_v22 = vld [vmem:[%s6325_s7 + $0x2] ss:$0 sm:$0xff] }
 0xc89   : > { %v1855_v23 = vpop.xlane.xlu0 %1854 }
 0xc8a   : > { %5131 = vrcp.f32 %v1855_v23 }
 0xc8d   : > { %v1861_v24 = vpop.permute.xlu0 %1860 }
 0xc8e   : > { %4748 = vmatpush3.msra.mxu0 %v1861_v24  ;;  %v4461_v24 = vld [vmem:[%s6325_s7 + $0x3] ss:$0 sm:$0xff] }
 0xc8f   : > { %4939 = vmatprep.subr.bf16.mxu0 %v4938_v32 }
 0xc90   : > { %v5130_v25 = vpop.eup %5129 }
 0xc91   : > { %v1858_v27 = vmul.f32 %v5130_v25, %v5126_v3  ;;  %v2023_v42 = vpop.permute.xlu0 %2022 }
 0xc92   : > { %v2039_v9 = vsel %vm2038_vm4, %v2036_v43, %v2023_v42  ;;  %v2301_v42 = vld [vmem:[%s6328_s10 + $0x38] sm:$0xff] }
 0xc93   : > { %4750 = vmatmul.mubr.msk.f32.vlgmr.msra.gmra.mrb[12].mxu0 %vm694_vm2, %v1858_v27  ;;  %v4966_v43 = vpack.c.bf16 %v2301_v42, %v2300_v41  ;;  %v4471_v42 = vld [vmem:[%s6325_s7 + $0x5] ss:$0 sm:$0xff] }
 0xc94   : > { %v5132_v28 = vpop.eup %5131  ;;  %4941 = vmatpush3.bf16.msra.mxu0 %v4938_v32  ;;  %v2294_v32 = vld [vmem:[%s6328_s10] sm:$0xff] }
 0xc95   : > { %v1859_v29 = vmul.f32 %v5132_v28, %v5128_v20  ;;  %4943 = vmatprep.subr.bf16.mxu0 %v4942_v35  ;;  %v4954_v34 = vpack.c.bf16 %v2295_v33, %v2294_v32 }
 0xc97   : > { %4755 = vmatmul.mubr.msk.f32.vlgmr.msra.gmra.mrb[18].mxu1 %vm694_vm2, %v1859_v29 }
 0xc98   : > { %4945 = vmatpush3.bf16.msra.mxu0 %v4942_v35  ;;  %4949 = vmatpush3.bf16.msra.mxu1 %v4946_v11  ;;  %v2296_v35 = vld [vmem:[%s6328_s10 + $0x10] sm:$0xff] }
 0xc99   : > { %4951 = vmatprep.subr.bf16.mxu1 %v4950_v15  ;;  %4955 = vmatprep.subr.bf16.mxu0 %v4954_v34 }
 0xc9c   : > { %4953 = vmatpush3.bf16.msra.mxu1 %v4950_v15 }
 0xd66   : > { %v1932_v36 = vpop.f32.mrb[12].mxu0 }
 0xd67   : > { %2030 = vrot.lane.b32.xlu0 %v1932_v36, %s6354_s0  ;;  %v4751_v37 = vpop.f32.mrb[13].mxu0  ;;  %v2297_v36 = vld [vmem:[%s6328_s10 + $0x18] sm:$0xff] }
 0xd68   : > { %v4958_v37 = vpack.c.bf16 %v2297_v36, %v2296_v35 }
 0xd6a   : > { %v2008_v38 = vpop.f32.mrb[18].mxu1 }
 0xd6b   : > { %2032 = vrot.lane.b32.xlu1 %v2008_v38, %s6354_s0  ;;  %v4756_v39 = vpop.f32.mrb[19].mxu1  ;;  %v2298_v38 = vld [vmem:[%s6328_s10 + $0x20] sm:$0xff] }
 0xd6c   : > { %v2299_v39 = vld [vmem:[%s6328_s10 + $0x28] sm:$0xff] }
 0xd6d   : > { %v4962_v40 = vpack.c.bf16 %v2299_v39, %v2298_v38  ;;  %v4470_v38 = vld [vmem:[%s6325_s7 + $0x4] ss:$0 sm:$0xff] }
 0xdd9   : > { %v2031_v47 = vpop.permute.xlu0 %2030 }
 0xdda   : > { %v2042_v48 = vsel %vm2041_vm3, %v2039_v9, %v2031_v47 }
 0xddb   : > { %4765 = vmatprep.mubr.msk.f32.mxu0 %vm496_vm0, %v2042_v48 }
 0xddd   : > { %v2033_v51 = vpop.permute.xlu1 %2032 }
 0xdde   : > { %v2043_v52 = vsel %vm2041_vm3, %v2040_v50, %v2033_v51 }
 0xddf   : > { %4766 = vmatmul.mubr.msk.f32.vlgmr.msra.gmra.mrb[14].mxu0 %vm496_vm0, %v2043_v52 }
 0xde0   : > { %4957 = vmatpush3.bf16.msra.mxu0 %v4954_v34 }
 0xde1   : > { %4959 = vmatprep.subr.bf16.mxu0 %v4958_v37 }
 0xde4   : > { %4961 = vmatpush3.bf16.msra.mxu0 %v4958_v37 }
 0xde5   : > { %4963 = vmatprep.subr.bf16.mxu0 %v4962_v40 }
 0xde8   : > { %4965 = vmatpush3.bf16.msra.mxu0 %v4962_v40 }
 0xde9   : > { %4967 = vmatprep.subr.bf16.mxu0 %v4966_v43 }
 0xdec   : > { %4969 = vmatpush3.bf16.msra.mxu0 %v4966_v43 }
 0xded   : > { %4819 = vmatprep.subr.mxu0 %v5362_v0 }
 0xeb2   : > { %v4767_v53 = vpop.f32.mrb[14].mxu0 }
 0xeb3   : > { %v2133_v54 = vadd.f32 %v4767_v53, %v4455_v44  ;;  %v2127_v55 = vpop.f32.mrb[15].mxu0 }
 0xeb4   : > { %v2128_v7 = vadd.f32 %v4455_v44, %v2127_v55 }
 0xeb5   : > { %v5890_v56 = vadd.f32 %v2133_v54, %v5659_v30 }
 0xeb6   : > { %v5893_v46 = vadd.f32 %v2128_v7, %v5655_v26 }
 0xeb7   : > { %v2145_v57 = vsel %vm496_vm0, %v5890_v56, 0.0 }
 0xeb8   : > { %2146 = vadd.xlane.f32.xlu1 %v2145_v57  ;;  %v2142_v58 = vsel %vm496_vm0, %v5893_v46, 0.0 }
 0xeb9   : > { %2143 = vadd.xlane.f32.xlu0 %v2142_v58 }
 0xf45   : > { %v2147_v59 = vpop.xlane.xlu1 %2146 }
 0xf46   : > { %v2149_v60 = vmul.f32 0.03125, %v2147_v59  ;;  %v2144_v61 = vpop.xlane.xlu0 %2143 }
 0xf47   : > { %v2148_v62 = vmul.f32 0.03125, %v2144_v61 }
 0xf48   : > { %v2151_v63 = vsub.f32 %v5890_v56, %v2149_v60 }
 0xf49   : > { %v2150_v30 = vsub.f32 %v5893_v46, %v2148_v62 }
 0xf4a   : > { %v2153_v2 = vmul.f32 %v2151_v63, %v2151_v63 }
 0xf4b   : > { %v2152_v1 = vmul.f32 %v2150_v30, %v2150_v30 }
 0xf4c   : > { %v2157_v4 = vsel %vm496_vm0, %v2153_v2, 0.0  ;;  %v4465_v2 = vld [vmem:[%s6384_s16] ss:$0 sm:$0xff] }
 0xf4d   : > { %v2154_v26 = vsel %vm496_vm0, %v2152_v1, 0.0 }
 0xf4e   : > { %2155 = vadd.xlane.f32.xlu0 %v2154_v26 }
 0xf52   : > { %2158 = vadd.xlane.f32.xlu0 %v2157_v4 }
 0xfdb   : > { %v2156_v16 = vpop.xlane.xlu0 %2155 }
 0xfdc   : > { %v2160_v17 = vmul.f32 0.03125, %v2156_v16 }
 0xfde   : > { %v2162_v18 = vadd.f32 1e-05, %v2160_v17 }
 0xfdf   : > { %v2159_v3 = vpop.xlane.xlu0 %2158 }
 0xfe0   : > { %5133 = vrsqrt.f32 %v2162_v18  ;;  %v2161_v19 = vmul.f32 0.03125, %v2159_v3 }
 0xfe2   : > { %v2163_v20 = vadd.f32 1e-05, %v2161_v19 }
 0xfe4   : > { %5135 = vrsqrt.f32 %v2163_v20 }
 0xfea   : > { %v5134_v21 = vpop.eup %5133 }
 0xfeb   : > { %v2166_v23 = vmul.f32 %v5134_v21, %v2150_v30 }
 0xfed   : > { %v2174_v25 = vmul.f32 %v4460_v22, %v2166_v23 }
 0xfee   : > { %v5136_v27 = vpop.eup %5135 }
 0xfef   : > { %v2167_v28 = vmul.f32 %v5136_v27, %v2151_v63  ;;  %v2182_v29 = vadd.f32 %v4461_v24, %v2174_v25  ;;  %v4473_v25 = vld [vmem:[%s6321_s3 + $0x28] sm:$0xff] }
 0xff1   : > { %v2175_v5 = vmul.f32 %v4460_v22, %v2167_v28  ;;  %4776 = vmatprep.mubr.msk.f32.mxu1 %vm496_vm0, %v2182_v29  ;;  %v4474_v28 = vld [vmem:[%s6321_s3 + $0x30] sm:$0xff]  ;;  %v4475_v29 = vld [vmem:[%s6321_s3 + $0x38] sm:$0xff] }
 0xff3   : > { %v2183_v31 = vadd.f32 %v4461_v24, %v2175_v5  ;;  %v4472_v24 = vld [vmem:[%s6321_s3 + $0x20] sm:$0xff]  ;;  %v4974_v5 = vpack.c.bf16 %v4475_v29, %v4474_v28 }
 0xff4   : > { %v4970_v27 = vpack.c.bf16 %v4473_v25, %v4472_v24  ;;  %v6065_v29 = vld [vmem:[%s5641_s13] ss:$0 sm:$0xff] }
 0xff5   : > { %4777 = vmatmul.mubr.msk.f32.vlgmr.msra.gmra.mrb[20].mxu1 %vm496_vm0, %v2183_v31 }
 0xff6   : > { %4971 = vmatprep.subr.bf16.mxu1 %v4970_v27 }
 0xff7   : > { %4973 = vmatpush3.bf16.msra.mxu1 %v4970_v27 }
 0xff8   : > { %4975 = vmatprep.subr.bf16.mxu1 %v4974_v5 }
 0xffb   : > { %4977 = vmatpush3.bf16.msra.mxu1 %v4974_v5 }
 0xffc   : > { %4809 = vmatprep.subr.mxu1 %v5362_v0 }
0x10c8   : > { %v4778_v9 = vpop.f32.mrb[20].mxu1 }
0x10c9   : > { %v2273_v47 = vadd.f32 %v4778_v9, %v4462_v45  ;;  %v2267_v48 = vpop.f32.mrb[21].mxu1 }
0x10ca   : > { %v2268_v49 = vadd.f32 %v4462_v45, %v2267_v48  ;;  %v4477_v48 = vld [vmem:[%s6322_s4 + $0x1] ss:$0 sm:$0xff] }
0x10cb   : > { %v2277_v50 = vmul.f32 %v2273_v47, %v2273_v47 }
0x10cc   : > { %v2276_v51 = vmul.f32 %v2268_v49, %v2268_v49 }
0x10cd   : > { %v2279_v52 = vmul.f32 %v2277_v50, %v2273_v47 }
0x10ce   : > { %v2278_v44 = vmul.f32 %v2276_v51, %v2268_v49 }
0x10cf   : > { %v2281_v53 = vmul.f32 0.044715, %v2279_v52 }
0x10d0   : > { %v2280_v54 = vmul.f32 0.044715, %v2278_v44 }
0x10d1   : > { %v2283_v55 = vadd.f32 %v2281_v53, %v2273_v47 }
0x10d2   : > { %v2282_v7 = vadd.f32 %v2280_v54, %v2268_v49 }
0x10d3   : > { %v2285_v57 = vmul.f32 0.7978846, %v2283_v55 }
0x10d4   : > { %v2284_v58 = vmul.f32 0.7978846, %v2282_v7 }
0x10d5   : > { %5137 = vtanh.f32 %v2285_v57 }
0x10d6   : > { %5139 = vtanh.f32 %v2284_v58 }
0x10df   : > { %v5138_v59 = vpop.eup %5137 }
0x10e0   : > { %v5140_v60 = vpop.eup %5139  ;;  %v2289_v61 = vadd.f32 1.0, %v5138_v59 }
0x10e1   : > { %v2288_v62 = vadd.f32 1.0, %v5140_v60 }
0x10e2   : > { %v2291_v63 = vmul.f32 0.5, %v2289_v61 }
0x10e3   : > { %v2290_v30 = vmul.f32 0.5, %v2288_v62 }
0x10e4   : > { %v2293_v26 = vmul.f32 %v2291_v63, %v2273_v47 }
0x10e5   : > { %v2292_v1 = vmul.f32 %v2290_v30, %v2268_v49 }
0x10e7   : > { %4795 = vmatprep.mubr.msk.f32.mxu0 %vm2309_vm5, %v2292_v1 }
0x10e8   : > { %4796 = vmatmul.mubr.msk.f32.vlgmr.msra.gmra.mrb[16].mxu0 %vm2309_vm5, %v2293_v26 }
0x10e9   : > { %4821 = vmatprep.mubr.msk.f32.mxu0 %vm5363_vm1, %v5362_v0 }
0x11bb   : > { %v4797_v4 = vpop.f32.mrb[16].mxu0 }
0x11bc   : > { %v2388_v6 = vadd.f32 %v4797_v4, %v4465_v2  ;;  %v2382_v8 = vpop.f32.mrb[17].mxu0 }
0x11bd   : > { %v2383_v11 = vadd.f32 %v4465_v2, %v2382_v8 }
0x11be   : > { %v5959_v12 = vadd.f32 %v2388_v6, %v5890_v56 }
0x11bf   : > { %v5962_v13 = vadd.f32 %v2383_v11, %v5893_v46 }
0x11c0   : > { %v2400_v15 = vsel %vm496_vm0, %v5959_v12, 0.0 }
0x11c1   : > { %2401 = vadd.xlane.f32.xlu1 %v2400_v15  ;;  %v2397_v16 = vsel %vm496_vm0, %v5962_v13, 0.0 }
0x11c2   : > { %2398 = vadd.xlane.f32.xlu0 %v2397_v16 }
0x124e   : > { %v2402_v17 = vpop.xlane.xlu1 %2401 }
0x124f   : > { %v2404_v18 = vmul.f32 0.03125, %v2402_v17  ;;  %v2399_v3 = vpop.xlane.xlu0 %2398 }
0x1250   : > { %v2403_v19 = vmul.f32 0.03125, %v2399_v3 }
0x1251   : > { %v2406_v20 = vsub.f32 %v5959_v12, %v2404_v18 }
0x1252   : > { %v2405_v56 = vsub.f32 %v5962_v13, %v2403_v19 }
0x1253   : > { %v2408_v21 = vmul.f32 %v2406_v20, %v2406_v20 }
0x1254   : > { %v2407_v22 = vmul.f32 %v2405_v56, %v2405_v56 }
0x1255   : > { %v2412_v46 = vsel %vm496_vm0, %v2408_v21, 0.0 }
0x1256   : > { %2413 = vadd.xlane.f32.xlu1 %v2412_v46  ;;  %v2409_v23 = vsel %vm496_vm0, %v2407_v22, 0.0 }
0x1257   : > { %2410 = vadd.xlane.f32.xlu0 %v2409_v23 }
0x12e3   : > { %v2414_v31 = vpop.xlane.xlu1 %2413 }
0x12e4   : > { %v2416_v32 = vmul.f32 0.03125, %v2414_v31  ;;  %v2411_v33 = vpop.xlane.xlu0 %2410 }
0x12e5   : > { %v2415_v34 = vmul.f32 0.03125, %v2411_v33 }
0x12e6   : > { %v2418_v35 = vadd.f32 1e-05, %v2416_v32 }
0x12e7   : > { %v2417_v36 = vadd.f32 1e-05, %v2415_v34 }
0x12e8   : > { %5141 = vrsqrt.f32 %v2418_v35  ;;  %v6070_v35 = vld [vmem:[%s5641_s13 + $0x1] ss:$0 sm:$0xff]  ;;  %s6385_s13 = smov 72  }
0x12e9   : > { %5143 = vrsqrt.f32 %v2417_v36 }
0x12f2   : > { %v5142_v37 = vpop.eup %5141 }
0x12f3   : > { %v5144_v39 = vpop.eup %5143  ;;  %v2422_v40 = vmul.f32 %v5142_v37, %v2406_v20 }
0x12f4   : > { %v2421_v41 = vmul.f32 %v5144_v39, %v2405_v56 }
0x12f5   : > { %v2430_v43 = vmul.f32 %v4470_v38, %v2422_v40 }
0x12f6   : > { %v2429_v45 = vmul.f32 %v4470_v38, %v2421_v41 }
0x12f7   : > { %v2438_v47 = vadd.f32 %v4471_v42, %v2430_v43 }
0x12f8   : > { %v2437_v9 = vadd.f32 %v4471_v42, %v2429_v45 }
0x12fa   : > { %4806 = vmatprep.mubr.msk.f32.mxu1 %vm496_vm0, %v2437_v9 }
0x12fb   : > { %4807 = vmatmul.mubr.msk.f32.vlgmr.msra.gmra.mrb[22].mxu1 %vm496_vm0, %v2438_v47 }
0x12fc   : > { %4811 = vmatprep.mubr.msk.f32.mxu1 %vm5363_vm1, %v5362_v0 }
0x13ce   : > { %v4808_v49 = vpop.f32.mrb[22].mxu1 }
0x13cf   : > { %v5998_v50 = vadd.f32 %v4808_v49, %v4477_v48  ;;  %v2524_v51 = vpop.f32.mrb[23].mxu1 }
0x13d0   : > { %v6000_v52 = vadd.f32 %v4477_v48, %v2524_v51 }
0x13d1   : > { %2614 = vrot.lane.b32.xlu1 %v5998_v50, %s5364_s29  ;;  %v6017_v55 = vmul.f32 0.35355338, %v5998_v50 }
0x13d2   : > { %2536 = vrot.lane.b32.xlu0 %v6000_v52, %s5364_s29  ;;  %v6008_v53 = vmul.f32 0.35355338, %v6000_v52  ;;  %s6386_s29 = smov 104  }
0x1443   : > { %v2615_v54 = vpop.permute.xlu1 %2614 }
0x1444   : > { %v2537_v44 = vpop.permute.xlu0 %2536 }
0x1445   : > { %4810 = vmatpush3.xpose.msk.msra.mxu1 %vm694_vm2, %v2537_v44 }
0x1446   : > { %4814 = vmatprep.subr.mxu1 %v5362_v0 }
0x1448   : > { %4812 = vmatmul.mubr.msk.f32.vlgmr.msra.gmra.mrb[24].mxu1 %vm694_vm2, %v6008_v53 }
0x1449   : > { %4815 = vmatpush3.xpose.msk.msra.mxu1 %vm694_vm2, %v2615_v54  ;;  %4816 = vmatprep.mubr.msk.f32.mxu1 %vm5363_vm1, %v5362_v0 }
0x144a   : > { %4824 = vmatprep.subr.mxu1 %v5362_v0 }
0x144c   : > { %4817 = vmatmul.mubr.msk.f32.vlgmr.msra.gmra.mrb[26].mxu1 %vm694_vm2, %v6017_v55 }
0x144d   : > { %4826 = vmatprep.mubr.msk.f32.mxu1 %vm5363_vm1, %v5362_v0 }
0x151b   : > { %v2609_v7 = vpop.f32.mrb[24].mxu1 }
0x151c   : > { %v2610_v57 = vadd.f32 %v5723_v10, %v2609_v7  ;;  %v4813_v58 = vpop.f32.mrb[25].mxu1 }
0x151e   : > { %v2691_v59 = vsel %vm694_vm2, %v2610_v57, -inf }
0x151f   : > { %2692 = vmax.xlane.f32.xlu1 %v2691_v59  ;;  %v2687_v60 = vpop.f32.mrb[26].mxu1 }
0x1520   : > { %v2688_v61 = vadd.f32 %v5727_v14, %v2687_v60  ;;  %v4818_v62 = vpop.f32.mrb[27].mxu1 }
0x1522   : > { %v2694_v63 = vsel %vm694_vm2, %v2688_v61, -inf }
0x1523   : > { %2695 = vmax.xlane.f32.xlu0 %v2694_v63 }
0x1530   : > { %2789 = vrot.lane.b32.xlu1 %v5998_v50, %s5365_s20 }
0x1534   : > { %2867 = vrot.lane.b32.xlu1 %v6000_v52, %s5366_s27 }
0x1538   : > { %2945 = vrot.lane.b32.xlu1 %v5998_v50, %s5366_s27  ;;  %s6388_s27 = smov 8  }
0x1539   : > { %2713 = vrot.lane.b32.xlu0 %v6000_v52, %s5365_s20  ;;  %s6387_s20 = smov 40  }
0x15ac   : > { %v2693_v10 = vpop.xlane.xlu1 %2692 }
0x15ad   : > { %v2697_v30 = vsub.f32 %v2610_v57, %v2693_v10 }
0x15af   : > { %v2699_v1 = vmul.f32 1.442695, %v2697_v30 }
0x15b0   : > { %v2790_v14 = vpop.permute.xlu1 %2789  ;;  %v2696_v26 = vpop.xlane.xlu0 %2695 }
0x15b1   : > { %5145 = vpow2.f32 %v2699_v1  ;;  %v2698_v2 = vsub.f32 %v2688_v61, %v2696_v26  ;;  %4825 = vmatpush3.msra.mxu1 %v2790_v14 }
0x15b2   : > { %4834 = vmatprep.subr.mxu1 %v5362_v0 }
0x15b3   : > { %v2701_v4 = vmul.f32 1.442695, %v2698_v2 }
0x15b4   : > { %v2714_v6 = vpop.permute.xlu0 %2713  ;;  %v2868_v17 = vpop.permute.xlu1 %2867 }
0x15b5   : > { %5147 = vpow2.f32 %v2701_v4  ;;  %4820 = vmatpush3.msra.mxu0 %v2714_v6 }
0x15b6   : > { %4829 = vmatprep.subr.mxu0 %v5362_v0 }
0x15b8   : > { %v2946_v18 = vpop.permute.xlu1 %2945 }
0x15bb   : > { %v5146_v8 = vpop.eup %5145 }
0x15bc   : > { %v2703_v11 = vsel %vm694_vm2, %v5146_v8, 0.0 }
0x15bd   : > { %2704 = vadd.xlane.f32.xlu0 %v2703_v11 }
0x15bf   : > { %v5148_v15 = vpop.eup %5147 }
0x15c0   : > { %v2706_v16 = vsel %vm694_vm2, %v5148_v15, 0.0 }
0x15c1   : > { %2707 = vadd.xlane.f32.xlu1 %v2706_v16 }
0x15d2   : > { %2943 = vrot.lane.b32.xlu1 %v6017_v55, %s5367_s14 }
0x15d3   : > { %2865 = vrot.lane.b32.xlu0 %v6008_v53, %s5367_s14  ;;  %s6389_s14 = smov 16  }
0x164a   : > { %v2705_v3 = vpop.xlane.xlu0 %2704 }
0x164b   : > { %5149 = vrcp.f32 %v2705_v3 }
0x164e   : > { %v2708_v19 = vpop.xlane.xlu1 %2707  ;;  %v2866_v46 = vpop.permute.xlu0 %2865 }
0x164f   : > { %5151 = vrcp.f32 %v2708_v19 }
0x1652   : > { %v2944_v23 = vpop.permute.xlu1 %2943 }
0x1655   : > { %v5150_v20 = vpop.eup %5149 }
0x1656   : > { %v2711_v56 = vmul.f32 %v5150_v20, %v5146_v8 }
0x1658   : > { %4822 = vmatmul.mubr.msk.f32.vlgmr.msra.gmra.mrb[18].mxu0 %vm694_vm2, %v2711_v56 }
0x1659   : > { %v5152_v21 = vpop.eup %5151  ;;  %4830 = vmatpush3.xpose.msk.msra.mxu0 %vm694_vm2, %v2868_v17  ;;  %4831 = vmatprep.mubr.msk.f32.mxu0 %vm5363_vm1, %v5362_v0 }
0x165a   : > { %v2712_v22 = vmul.f32 %v5152_v21, %v5148_v15  ;;  %4839 = vmatprep.subr.mxu0 %v5362_v0 }
0x165c   : > { %4827 = vmatmul.mubr.msk.f32.vlgmr.msra.gmra.mrb[28].mxu1 %vm694_vm2, %v2712_v22  ;;  %4832 = vmatmul.mubr.msk.f32.vlgmr.msra.gmra.mrb[20].mxu0 %vm694_vm2, %v2866_v46 }
0x165d   : > { %4835 = vmatpush3.xpose.msk.msra.mxu1 %vm694_vm2, %v2946_v18  ;;  %4836 = vmatprep.mubr.msk.f32.mxu1 %vm5363_vm1, %v5362_v0 }
0x165e   : > { %4844 = vmatprep.subr.mxu1 %v5362_v0  ;;  %4841 = vmatprep.mubr.msk.f32.mxu0 %vm5363_vm1, %v5362_v0 }
0x1660   : > { %4837 = vmatmul.mubr.msk.f32.vlgmr.msra.gmra.mrb[30].mxu1 %vm694_vm2, %v2944_v23 }
0x1661   : > { %4846 = vmatprep.mubr.msk.f32.mxu1 %vm5363_vm1, %v5362_v0 }
0x172b   : > { %v6060_v24 = vpop.f32.mrb[18].mxu0 }
0x172c   : > { %v4823_v25 = vpop.f32.mrb[19].mxu0 }
0x172f   : > { %v6062_v27 = vpop.f32.mrb[28].mxu1  ;;  %v2939_v28 = vpop.f32.mrb[20].mxu0 }
0x1730   : > { %v2940_v5 = vadd.f32 %v6065_v29, %v2939_v28  ;;  %v4828_v31 = vpop.f32.mrb[29].mxu1  ;;  %v4833_v32 = vpop.f32.mrb[21].mxu0 }
0x1732   : > { %v3021_v33 = vsel %vm694_vm2, %v2940_v5, -inf }
0x1733   : > { %3022 = vmax.xlane.f32.xlu0 %v3021_v33  ;;  %v3017_v34 = vpop.f32.mrb[30].mxu1 }
0x1734   : > { %v3018_v36 = vadd.f32 %v6070_v35, %v3017_v34  ;;  %v4838_v37 = vpop.f32.mrb[31].mxu1 }
0x1736   : > { %v3024_v38 = vsel %vm694_vm2, %v3018_v36, -inf }
0x1737   : > { %3025 = vmax.xlane.f32.xlu1 %v3024_v38 }
0x1748   : > { %3119 = vrot.lane.b32.xlu1 %v5998_v50, %s5368_s23 }
0x1749   : > { %3043 = vrot.lane.b32.xlu0 %v6000_v52, %s5368_s23 }
0x174c   : > { %3197 = vrot.lane.b32.xlu1 %v6000_v52, %s5369_s19 }
0x1750   : > { %3275 = vrot.lane.b32.xlu1 %v5998_v50, %s5369_s19 }
0x1754   : > { %3273 = vrot.lane.b32.xlu1 %v6017_v55, %s5370_s17 }
0x17c0   : > { %v3023_v39 = vpop.xlane.xlu0 %3022 }
0x17c1   : > { %v3027_v40 = vsub.f32 %v2940_v5, %v3023_v39 }
0x17c3   : > { %v3029_v41 = vmul.f32 1.442695, %v3027_v40 }
0x17c4   : > { %v3044_v42 = vpop.permute.xlu0 %3043  ;;  %v3026_v43 = vpop.xlane.xlu1 %3025 }
0x17c5   : > { %5153 = vpow2.f32 %v3029_v41  ;;  %v3028_v45 = vsub.f32 %v3018_v36, %v3026_v43  ;;  %4840 = vmatpush3.msra.mxu0 %v3044_v42 }
0x17c6   : > { %4849 = vmatprep.subr.mxu0 %v5362_v0 }
0x17c7   : > { %v3031_v9 = vmul.f32 1.442695, %v3028_v45 }
0x17c8   : > { %v3120_v47 = vpop.permute.xlu1 %3119 }
0x17c9   : > { %5155 = vpow2.f32 %v3031_v9  ;;  %4845 = vmatpush3.msra.mxu1 %v3120_v47 }
0x17ca   : > { %4854 = vmatprep.subr.mxu1 %v5362_v0 }
0x17cc   : > { %v3198_v57 = vpop.permute.xlu1 %3197 }
0x17cf   : > { %v5154_v48 = vpop.eup %5153 }
0x17d0   : > { %v3033_v49 = vsel %vm694_vm2, %v5154_v48, 0.0  ;;  %v3276_v61 = vpop.permute.xlu1 %3275 }
0x17d1   : > { %3034 = vadd.xlane.f32.xlu0 %v3033_v49 }
0x17d3   : > { %v5156_v51 = vpop.eup %5155 }
0x17d4   : > { %v3036_v44 = vsel %vm694_vm2, %v5156_v51, 0.0  ;;  %v3274_v10 = vpop.permute.xlu1 %3273 }
0x17d5   : > { %3037 = vadd.xlane.f32.xlu0 %v3036_v44 }
0x17eb   : > { %3195 = vrot.lane.b32.xlu0 %v6008_v53, %s5370_s17  ;;  %s6393_s17 = sld [smem:[#allocation22_spill]] }
0x185e   : > { %v3035_v54 = vpop.xlane.xlu0 %3034 }
0x185f   : > { %5157 = vrcp.f32 %v3035_v54 }
0x1862   : > { %v3038_v7 = vpop.xlane.xlu0 %3037 }
0x1863   : > { %5159 = vrcp.f32 %v3038_v7 }
0x1866   : > { %v3196_v63 = vpop.permute.xlu0 %3195 }
0x1869   : > { %v5158_v58 = vpop.eup %5157 }
0x186a   : > { %v3041_v59 = vmul.f32 %v5158_v58, %v5154_v48 }
0x186c   : > { %4842 = vmatmul.mubr.msk.f32.vlgmr.msra.gmra.mrb[22].mxu0 %vm694_vm2, %v3041_v59 }
0x186d   : > { %v5160_v60 = vpop.eup %5159  ;;  %4850 = vmatpush3.xpose.msk.msra.mxu0 %vm694_vm2, %v3198_v57  ;;  %4851 = vmatprep.mubr.msk.f32.mxu0 %vm5363_vm1, %v5362_v0 }
0x186e   : > { %v3042_v62 = vmul.f32 %v5160_v60, %v5156_v51  ;;  %4859 = vmatprep.subr.mxu0 %v5362_v0 }
0x1870   : > { %4847 = vmatmul.mubr.msk.f32.vlgmr.msra.gmra.mrb[32].mxu1 %vm694_vm2, %v3042_v62  ;;  %4852 = vmatmul.mubr.msk.f32.vlgmr.msra.gmra.mrb[24].mxu0 %vm694_vm2, %v3196_v63 }
0x1871   : > { %4855 = vmatpush3.xpose.msk.msra.mxu1 %vm694_vm2, %v3276_v61  ;;  %4856 = vmatprep.mubr.msk.f32.mxu1 %vm5363_vm1, %v5362_v0 }
0x1872   : > { %4864 = vmatprep.subr.mxu1 %v5362_v0  ;;  %4861 = vmatprep.mubr.msk.f32.mxu0 %vm5363_vm1, %v5362_v0 }
0x1874   : > { %4857 = vmatmul.mubr.msk.f32.vlgmr.msra.gmra.mrb[34].mxu1 %vm694_vm2, %v3274_v10 }
0x1875   : > { %4866 = vmatprep.mubr.msk.f32.mxu1 %vm5363_vm1, %v5362_v0 }
0x193f   : > { %v6106_v30 = vpop.f32.mrb[22].mxu0 }
0x1940   : > { %v4843_v1 = vpop.f32.mrb[23].mxu0 }
0x1943   : > { %v6108_v14 = vpop.f32.mrb[32].mxu1  ;;  %v3269_v26 = vpop.f32.mrb[24].mxu0 }
0x1944   : > { %v3270_v2 = vadd.f32 %v6065_v29, %v3269_v26  ;;  %v4848_v4 = vpop.f32.mrb[33].mxu1  ;;  %v4853_v6 = vpop.f32.mrb[25].mxu0 }
0x1945   : > { %v4505_v4 = vld [vmem:[%s6323_s5 + $0x28] sm:$0xff] }
0x1946   : > { %v3351_v8 = vsel %vm694_vm2, %v3270_v2, -inf }
0x1947   : > { %3352 = vmax.xlane.f32.xlu0 %v3351_v8  ;;  %v3347_v11 = vpop.f32.mrb[34].mxu1  ;;  %v4506_v8 = vld [vmem:[%s6323_s5 + $0x30] sm:$0xff] }
0x1948   : > { %v3348_v15 = vadd.f32 %v6070_v35, %v3347_v11  ;;  %v4858_v16 = vpop.f32.mrb[35].mxu1  ;;  %v4507_v11 = vld [vmem:[%s6323_s5 + $0x38] sm:$0xff] }
0x194a   : > { %v3354_v17 = vsel %vm694_vm2, %v3348_v15, -inf }
0x194b   : > { %3355 = vmax.xlane.f32.xlu1 %v3354_v17 }
0x195c   : > { %3449 = vrot.lane.b32.xlu1 %v5998_v50, %s5371_s15 }
0x195d   : > { %3373 = vrot.lane.b32.xlu0 %v6000_v52, %s5371_s15 }
0x1960   : > { %3527 = vrot.lane.b32.xlu1 %v6000_v52, %s6385_s13 }
0x1964   : > { %3605 = vrot.lane.b32.xlu1 %v5998_v50, %s6385_s13  ;;  %s4545_s13 = sshll.u32 %s5466_s25, 8  ;;  %s4288_s25 = scalar_lea.sflag [#allocation4], %s5629_s30 }
0x1965   : > { %s6269_s15 = scalar_lea.hbm %s6393_s17, %s4545_s13 }
0x1968   : > { %3603 = vrot.lane.b32.xlu1 %v6017_v55, %s6386_s29 }
0x19d4   : > { %v3353_v18 = vpop.xlane.xlu0 %3352 }
0x19d5   : > { %v3357_v3 = vsub.f32 %v3270_v2, %v3353_v18 }
0x19d7   : > { %v3359_v19 = vmul.f32 1.442695, %v3357_v3 }
0x19d8   : > { %v3374_v20 = vpop.permute.xlu0 %3373  ;;  %v3356_v56 = vpop.xlane.xlu1 %3355 }
0x19d9   : > { %5161 = vpow2.f32 %v3359_v19  ;;  %v3358_v21 = vsub.f32 %v3348_v15, %v3356_v56  ;;  %4860 = vmatpush3.msra.mxu0 %v3374_v20  ;;  %v4982_v15 = vpack.c.bf16 %v4507_v11, %v4506_v8  ;;  %v4527_v8 = vld [vmem:[%s6328_s10 + $0x58] sm:$0xff] }
0x19da   : > { %4869 = vmatprep.subr.mxu0 %v5362_v0 }
0x19db   : > { %v3361_v22 = vmul.f32 1.442695, %v3358_v21 }
0x19dc   : > { %v3450_v46 = vpop.permute.xlu1 %3449 }
0x19dd   : > { %5163 = vpow2.f32 %v3361_v22  ;;  %4865 = vmatpush3.msra.mxu1 %v3450_v46 }
0x19de   : > { %4874 = vmatprep.subr.mxu1 %v5362_v0 }
0x19e0   : > { %v3528_v32 = vpop.permute.xlu1 %3527 }
0x19e3   : > { %v5162_v23 = vpop.eup %5161 }
0x19e4   : > { %v3363_v25 = vsel %vm694_vm2, %v5162_v23, 0.0  ;;  %v3606_v37 = vpop.permute.xlu1 %3605 }
0x19e5   : > { %3364 = vadd.xlane.f32.xlu0 %v3363_v25 }
0x19e7   : > { %v5164_v55 = vpop.eup %5163 }
0x19e8   : > { %v3366_v28 = vsel %vm694_vm2, %v5164_v55, 0.0  ;;  %v3604_v39 = vpop.permute.xlu1 %3603 }
0x19e9   : > { %3367 = vadd.xlane.f32.xlu0 %v3366_v28 }
0x19ff   : > { %3525 = vrot.lane.b32.xlu0 %v6008_v53, %s6386_s29  ;;  %s6392_s29 = sshll.u32 %s5629_s30, 4 }
0x1a72   : > { %v3365_v5 = vpop.xlane.xlu0 %3364 }
0x1a73   : > { %5165 = vrcp.f32 %v3365_v5 }
0x1a76   : > { %v3368_v31 = vpop.xlane.xlu0 %3367 }
0x1a77   : > { %5167 = vrcp.f32 %v3368_v31 }
0x1a7a   : > { %v3526_v53 = vpop.permute.xlu0 %3525 }
0x1a7d   : > { %v5166_v33 = vpop.eup %5165 }
0x1a7e   : > { %v3371_v34 = vmul.f32 %v5166_v33, %v5162_v23 }
0x1a80   : > { %4862 = vmatmul.mubr.msk.f32.vlgmr.msra.gmra.mrb[26].mxu0 %vm694_vm2, %v3371_v34 }
0x1a81   : > { %v5168_v36 = vpop.eup %5167  ;;  %4870 = vmatpush3.xpose.msk.msra.mxu0 %vm694_vm2, %v3528_v32  ;;  %4871 = vmatprep.mubr.msk.f32.mxu0 %vm5363_vm1, %v5362_v0 }
0x1a82   : > { %v3372_v38 = vmul.f32 %v5168_v36, %v5164_v55  ;;  %4879 = vmatprep.subr.mxu0 %v5362_v0 }
0x1a84   : > { %4867 = vmatmul.mubr.msk.f32.vlgmr.msra.gmra.mrb[36].mxu1 %vm694_vm2, %v3372_v38  ;;  %4872 = vmatmul.mubr.msk.f32.vlgmr.msra.gmra.mrb[28].mxu0 %vm694_vm2, %v3526_v53 }
0x1a85   : > { %4875 = vmatpush3.xpose.msk.msra.mxu1 %vm694_vm2, %v3606_v37  ;;  %4876 = vmatprep.mubr.msk.f32.mxu1 %vm5363_vm1, %v5362_v0 }
0x1a86   : > { %4884 = vmatprep.subr.mxu1 %v5362_v0  ;;  %4881 = vmatprep.mubr.msk.f32.mxu0 %vm5363_vm1, %v5362_v0 }
0x1a88   : > { %4877 = vmatmul.mubr.msk.f32.vlgmr.msra.gmra.mrb[38].mxu1 %vm694_vm2, %v3604_v39 }
0x1a89   : > { %4886 = vmatprep.mubr.msk.f32.mxu1 %vm5363_vm1, %v5362_v0 }
0x1b53   : > { %v3445_v40 = vpop.f32.mrb[26].mxu0 }
0x1b54   : > { %v4863_v41 = vpop.f32.mrb[27].mxu0 }
0x1b57   : > { %v3521_v42 = vpop.f32.mrb[36].mxu1  ;;  %v3599_v43 = vpop.f32.mrb[28].mxu0 }
0x1b58   : > { %v3600_v45 = vadd.f32 %v6065_v29, %v3599_v43  ;;  %v4868_v9 = vpop.f32.mrb[37].mxu1  ;;  %v4873_v47 = vpop.f32.mrb[29].mxu0 }
0x1b5a   : > { %v3681_v48 = vsel %vm694_vm2, %v3600_v45, -inf }
0x1b5b   : > { %3682 = vmax.xlane.f32.xlu0 %v3681_v48  ;;  %v3677_v49 = vpop.f32.mrb[38].mxu1  ;;  %v4516_v48 = vld [vmem:[%s6326_s8 + $0x20] sm:$0xff] }
0x1b5c   : > { %v3678_v51 = vadd.f32 %v6070_v35, %v3677_v49  ;;  %v4878_v44 = vpop.f32.mrb[39].mxu1  ;;  %v4517_v49 = vld [vmem:[%s6326_s8 + $0x28] sm:$0xff] }
0x1b5d   : > { %v4518_v44 = vld [vmem:[%s6326_s8 + $0x30] sm:$0xff] }
0x1b5e   : > { %v3684_v54 = vsel %vm694_vm2, %v3678_v51, -inf }
0x1b5f   : > { %3685 = vmax.xlane.f32.xlu1 %v3684_v54  ;;  %v4519_v54 = vld [vmem:[%s6326_s8 + $0x38] sm:$0xff] }
0x1b70   : > { %3779 = vrot.lane.b32.xlu1 %v5998_v50, %s6387_s20 }
0x1b74   : > { %3857 = vrot.lane.b32.xlu1 %v6106_v30, %s6388_s27 }
0x1b78   : > { %3859 = vrot.lane.b32.xlu1 %v6108_v14, %s6388_s27 }
0x1b7c   : > { %3867 = vrot.lane.b32.xlu1 %v3521_v42, %s6389_s14 }
0x1be8   : > { %v3683_v0 = vpop.xlane.xlu0 %3682 }
0x1be9   : > { %v3687_v29 = vsub.f32 %v3600_v45, %v3683_v0  ;;  %v4990_v0 = vpack.c.bf16 %v4519_v54, %v4518_v44 }
0x1beb   : > { %v3689_v7 = vmul.f32 1.442695, %v3687_v29 }
0x1bec   : > { %v3686_v57 = vpop.xlane.xlu1 %3685 }
0x1bed   : > { %5169 = vpow2.f32 %v3689_v7  ;;  %v3688_v35 = vsub.f32 %v3678_v51, %v3686_v57  ;;  %v4986_v51 = vpack.c.bf16 %v4517_v49, %v4516_v48 }
0x1bef   : > { %v3691_v58 = vmul.f32 1.442695, %v3688_v35 }
0x1bf0   : > { %v3780_v59 = vpop.permute.xlu1 %3779 }
0x1bf1   : > { %5171 = vpow2.f32 %v3691_v58  ;;  %4885 = vmatpush3.msra.mxu1 %v3780_v59 }
0x1bf2   : > { %4987 = vmatprep.subr.bf16.mxu1 %v4986_v51 }
0x1bf4   : > { %v3858_v19 = vpop.permute.xlu1 %3857 }
0x1bf5   : > { %v3879_v21 = vsel %vm694_vm2, %v6060_v24, %v3858_v19  ;;  %v4509_v24 = vld [vmem:[%s6324_s6 + $0x1] ss:$0 sm:$0xff] }
0x1bf7   : > { %v5170_v60 = vpop.eup %5169 }
0x1bf8   : > { %v3693_v50 = vsel %vm694_vm2, %v5170_v60, 0.0  ;;  %v3860_v20 = vpop.permute.xlu1 %3859 }
0x1bf9   : > { %3694 = vadd.xlane.f32.xlu0 %v3693_v50  ;;  %v3880_v55 = vsel %vm694_vm2, %v6062_v27, %v3860_v20  ;;  %v4514_v50 = vld [vmem:[%s6325_s7 + $0x6] ss:$0 sm:$0xff]  ;;  %v4521_v20 = vld [vmem:[%s6327_s9 + $0x1] ss:$0 sm:$0xff] }
0x1bfb   : > { %v5172_v61 = vpop.eup %5171 }
0x1bfc   : > { %v3696_v62 = vsel %vm694_vm2, %v5172_v61, 0.0  ;;  %v3868_v22 = vpop.permute.xlu1 %3867 }
0x1bfd   : > { %3697 = vadd.xlane.f32.xlu0 %v3696_v62  ;;  %v3882_v28 = vsel %vm2038_vm4, %v3880_v55, %v3868_v22  ;;  %v4515_v62 = vld [vmem:[%s6325_s7 + $0x7] ss:$0 sm:$0xff] }
0x1c13   : > { %3703 = vrot.lane.b32.xlu0 %v6000_v52, %s6387_s20  ;;  %v4504_v52 = vld [vmem:[%s6323_s5 + $0x20] sm:$0xff]  ;;  %s485_s20 = scalar_lea.vmem [#allocation8], %s6392_s29 }
0x1c14   : > { %v4978_v6 = vpack.c.bf16 %v4505_v4, %v4504_v52  ;;  %v4525_v52 = vld [vmem:[%s6328_s10 + $0x48] sm:$0xff] }
0x1c17   : > { %3865 = vrot.lane.b32.xlu0 %v3445_v40, %s6389_s14  ;;  %s4301_s14 = sshll.u32 %s485_s20, 4  ;;  %s6271_s14 = int_to_ptr.vmem [resolvable:$true] %s4301_s14 }
0x1c18   : > { %s5279_s21 = scalar_lea.vmem %s6271_s14, 256  ;;  %p5286_p1 = scmp.lt.s32.totalorder %s6271_s14, %s5284_s11 }
0x1c19   : > { %p5280_p3 = scmp.ne.s32.totalorder %s6271_s14, %s5279_s21  ;;  %p5287_p5 = scmp.lt.s32.totalorder %s5285_s26, %s5279_s21 }
0x1c1b   : > { %p5281_p7 = pnand %p5280_p3, %p5539_p12  ;;  %p5288_p2 = por %p5287_p5, %p5286_p1 }
0x1c1d   : > { %p5282_p9 = pneg %p5281_p7 }
0x1c1f   : > { %p5289_p6 = pnand %p5288_p2, %p5282_p9 }
0x1c86   : > { %v3695_v63 = vpop.xlane.xlu0 %3694 }
0x1c87   : > { %5173 = vrcp.f32 %v3695_v63 }
0x1c8a   : > { %v3698_v10 = vpop.xlane.xlu0 %3697 }
0x1c8b   : > { %5175 = vrcp.f32 %v3698_v10 }
0x1c8e   : > { %v3704_v30 = vpop.permute.xlu0 %3703 }
0x1c8f   : > { %4880 = vmatpush3.msra.mxu0 %v3704_v30 }
0x1c90   : > { %4979 = vmatprep.subr.bf16.mxu0 %v4978_v6 }
0x1c91   : > { %v5174_v1 = vpop.eup %5173 }
0x1c92   : > { %v3701_v14 = vmul.f32 %v5174_v1, %v5170_v60  ;;  %v3866_v56 = vpop.permute.xlu0 %3865 }
0x1c93   : > { %v3881_v46 = vsel %vm2038_vm4, %v3879_v21, %v3866_v56 }
0x1c94   : > { %4882 = vmatmul.mubr.msk.f32.vlgmr.msra.gmra.mrb[30].mxu0 %vm694_vm2, %v3701_v14 }
0x1c95   : > { %v5176_v26 = vpop.eup %5175  ;;  %4981 = vmatpush3.bf16.msra.mxu0 %v4978_v6  ;;  %v4526_v6 = vld [vmem:[%s6328_s10 + $0x50] sm:$0xff] }
0x1c96   : > { %v3702_v2 = vmul.f32 %v5176_v26, %v5172_v61  ;;  %4983 = vmatprep.subr.bf16.mxu0 %v4982_v15  ;;  %v4998_v11 = vpack.c.bf16 %v4527_v8, %v4526_v6 }
0x1c98   : > { %4887 = vmatmul.mubr.msk.f32.vlgmr.msra.gmra.mrb[40].mxu1 %vm694_vm2, %v3702_v2  ;;  %v4524_v2 = vld [vmem:[%s6328_s10 + $0x40] sm:$0xff] }
0x1c99   : > { %4985 = vmatpush3.bf16.msra.mxu0 %v4982_v15  ;;  %4989 = vmatpush3.bf16.msra.mxu1 %v4986_v51  ;;  %v4994_v4 = vpack.c.bf16 %v4525_v52, %v4524_v2  ;;  %v4528_v15 = vld [vmem:[%s6328_s10 + $0x60] sm:$0xff] }
0x1c9a   : > { %4991 = vmatprep.subr.bf16.mxu1 %v4990_v0  ;;  %v4537_v2 = vld [vmem:[#allocation7 + $0x3] ss:$0 sm:$0xff] }
0x1c9b   : > { %4995 = vmatprep.subr.bf16.mxu0 %v4994_v4 }
0x1c9d   : > { %4993 = vmatpush3.bf16.msra.mxu1 %v4990_v0 }
0x1d67   : > { %v3775_v16 = vpop.f32.mrb[30].mxu0 }
0x1d68   : > { %3873 = vrot.lane.b32.xlu0 %v3775_v16, %s6390_s2  ;;  %v4883_v17 = vpop.f32.mrb[31].mxu0  ;;  %v4529_v16 = vld [vmem:[%s6328_s10 + $0x68] sm:$0xff] }
0x1d69   : > { %v5002_v17 = vpack.c.bf16 %v4529_v16, %v4528_v15 }
0x1d6b   : > { %v3851_v18 = vpop.f32.mrb[40].mxu1 }
0x1d6c   : > { %3875 = vrot.lane.b32.xlu1 %v3851_v18, %s6390_s2  ;;  %v4888_v3 = vpop.f32.mrb[41].mxu1  ;;  %v4530_v18 = vld [vmem:[%s6328_s10 + $0x70] sm:$0xff] }
0x1d6d   : > { %v4531_v3 = vld [vmem:[%s6328_s10 + $0x78] sm:$0xff] }
0x1d6e   : > { %v5006_v19 = vpack.c.bf16 %v4531_v3, %v4530_v18 }
0x1dda   : > { %v3874_v23 = vpop.permute.xlu0 %3873 }
0x1ddb   : > { %v3883_v25 = vsel %vm2041_vm3, %v3881_v46, %v3874_v23 }
0x1ddc   : > { %4897 = vmatprep.mubr.msk.f32.mxu0 %vm496_vm0, %v3883_v25 }
0x1dde   : > { %v3876_v5 = vpop.permute.xlu1 %3875 }
0x1ddf   : > { %v3884_v31 = vsel %vm2041_vm3, %v3882_v28, %v3876_v5 }
0x1de0   : > { %4898 = vmatmul.mubr.msk.f32.vlgmr.msra.gmra.mrb[32].mxu0 %vm496_vm0, %v3884_v31 }
0x1de1   : > { %4997 = vmatpush3.bf16.msra.mxu0 %v4994_v4 }
0x1de2   : > { %4999 = vmatprep.subr.bf16.mxu0 %v4998_v11 }
0x1de5   : > { %5001 = vmatpush3.bf16.msra.mxu0 %v4998_v11 }
0x1de6   : > { %5003 = vmatprep.subr.bf16.mxu0 %v5002_v17 }
0x1de9   : > { %5005 = vmatpush3.bf16.msra.mxu0 %v5002_v17 }
0x1dea   : > { %5007 = vmatprep.subr.bf16.mxu0 %v5006_v19 }
0x1ded   : > { %5009 = vmatpush3.bf16.msra.mxu0 %v5006_v19 }
0x1eb3   : > { %v4899_v32 = vpop.f32.mrb[32].mxu0 }
0x1eb4   : > { %v3976_v33 = vadd.f32 %v4899_v32, %v4509_v24  ;;  %v3970_v34 = vpop.f32.mrb[33].mxu0 }
0x1eb5   : > { %v3971_v36 = vadd.f32 %v4509_v24, %v3970_v34 }
0x1eb6   : > { %v6192_v37 = vadd.f32 %v3976_v33, %v5959_v12 }
0x1eb7   : > { %v6195_v27 = vadd.f32 %v3971_v36, %v5962_v13 }
0x1eb8   : > { %v3988_v38 = vsel %vm496_vm0, %v6192_v37, 0.0 }
0x1eb9   : > { %3989 = vadd.xlane.f32.xlu1 %v3988_v38  ;;  %v3985_v53 = vsel %vm496_vm0, %v6195_v27, 0.0 }
0x1eba   : > { %3986 = vadd.xlane.f32.xlu0 %v3985_v53 }
0x1f46   : > { %v3990_v39 = vpop.xlane.xlu1 %3989 }
0x1f47   : > { %v3992_v40 = vmul.f32 0.03125, %v3990_v39  ;;  %v3987_v41 = vpop.xlane.xlu0 %3986 }
0x1f48   : > { %v3991_v42 = vmul.f32 0.03125, %v3987_v41 }
0x1f49   : > { %v3994_v43 = vsub.f32 %v6192_v37, %v3992_v40 }
0x1f4a   : > { %v3993_v12 = vsub.f32 %v6195_v27, %v3991_v42 }
0x1f4b   : > { %v3996_v9 = vmul.f32 %v3994_v43, %v3994_v43 }
0x1f4c   : > { %v3995_v45 = vmul.f32 %v3993_v12, %v3993_v12 }
0x1f4d   : > { %v4000_v47 = vsel %vm496_vm0, %v3996_v9, 0.0 }
0x1f4e   : > { %v3997_v13 = vsel %vm496_vm0, %v3995_v45, 0.0 }
0x1f4f   : > { %3998 = vadd.xlane.f32.xlu0 %v3997_v13 }
0x1f53   : > { %4001 = vadd.xlane.f32.xlu0 %v4000_v47 }
0x1fdc   : > { %v3999_v29 = vpop.xlane.xlu0 %3998 }
0x1fdd   : > { %v4003_v7 = vmul.f32 0.03125, %v3999_v29 }
0x1fdf   : > { %v4005_v57 = vadd.f32 1e-05, %v4003_v7 }
0x1fe0   : > { %v4002_v35 = vpop.xlane.xlu0 %4001 }
0x1fe1   : > { %5177 = vrsqrt.f32 %v4005_v57  ;;  %v4004_v58 = vmul.f32 0.03125, %v4002_v35 }
0x1fe3   : > { %v4006_v59 = vadd.f32 1e-05, %v4004_v58 }
0x1fe5   : > { %5179 = vrsqrt.f32 %v4006_v59 }
0x1feb   : > { %v5178_v60 = vpop.eup %5177 }
0x1fec   : > { %v4009_v61 = vmul.f32 %v5178_v60, %v3993_v12  ;;  %v4533_v12 = vld [vmem:[%s6384_s16 + $0x1] ss:$0 sm:$0xff] }
0x1fee   : > { %v4017_v63 = vmul.f32 %v4514_v50, %v4009_v61 }
0x1fef   : > { %v5180_v10 = vpop.eup %5179 }
0x1ff0   : > { %v4010_v30 = vmul.f32 %v5180_v10, %v3994_v43  ;;  %v4025_v1 = vadd.f32 %v4515_v62, %v4017_v63 }
0x1ff2   : > { %v4018_v14 = vmul.f32 %v4514_v50, %v4010_v30  ;;  %4908 = vmatprep.mubr.msk.f32.mxu1 %vm496_vm0, %v4025_v1  ;;  %v4536_v1 = vld [vmem:[#allocation7 + $0x2] ss:$0 sm:$0xff] }
0x1ff4   : > { %v4026_v26 = vadd.f32 %v4515_v62, %v4018_v14 }
0x1ff6   : > { %4909 = vmatmul.mubr.msk.f32.vlgmr.msra.gmra.mrb[42].mxu1 %vm496_vm0, %v4026_v26 }
0x20c9   : > { %v4910_v56 = vpop.f32.mrb[42].mxu1 }
0x20ca   : > { %v4118_v21 = vadd.f32 %v4910_v56, %v4521_v20  ;;  %v4112_v22 = vpop.f32.mrb[43].mxu1 }
0x20cb   : > { %v4113_v46 = vadd.f32 %v4521_v20, %v4112_v22 }
0x20cc   : > { %v4122_v23 = vmul.f32 %v4118_v21, %v4118_v21 }
0x20cd   : > { %v4121_v25 = vmul.f32 %v4113_v46, %v4113_v46 }
0x20ce   : > { %v4124_v55 = vmul.f32 %v4122_v23, %v4118_v21 }
0x20cf   : > { %v4123_v28 = vmul.f32 %v4121_v25, %v4113_v46 }
0x20d0   : > { %v4126_v5 = vmul.f32 0.044715, %v4124_v55 }
0x20d1   : > { %v4125_v31 = vmul.f32 0.044715, %v4123_v28 }
0x20d2   : > { %v4128_v24 = vadd.f32 %v4126_v5, %v4118_v21 }
0x20d3   : > { %v4127_v32 = vadd.f32 %v4125_v31, %v4113_v46 }
0x20d4   : > { %v4130_v33 = vmul.f32 0.7978846, %v4128_v24 }
0x20d5   : > { %v4129_v34 = vmul.f32 0.7978846, %v4127_v32 }
0x20d6   : > { %5181 = vtanh.f32 %v4130_v33 }
0x20d7   : > { %5183 = vtanh.f32 %v4129_v34 }
0x20e0   : > { %v5182_v36 = vpop.eup %5181 }
0x20e1   : > { %v5184_v38 = vpop.eup %5183  ;;  %v4134_v53 = vadd.f32 1.0, %v5182_v36 }
0x20e2   : > { %v4133_v39 = vadd.f32 1.0, %v5184_v38 }
0x20e3   : > { %v4136_v40 = vmul.f32 0.5, %v4134_v53 }
0x20e4   : > { %v4135_v41 = vmul.f32 0.5, %v4133_v39 }
0x20e5   : > { %v4138_v43 = vmul.f32 %v4136_v40, %v4118_v21 }
0x20e6   : > { %v4137_v42 = vmul.f32 %v4135_v41, %v4113_v46 }
0x20e8   : > { %4927 = vmatprep.mubr.msk.f32.mxu0 %vm2309_vm5, %v4137_v42 }
0x20e9   : > { %4928 = vmatmul.mubr.msk.f32.vlgmr.msra.gmra.mrb[34].mxu0 %vm2309_vm5, %v4138_v43 }
0x21bc   : > { %v4929_v45 = vpop.f32.mrb[34].mxu0 }
0x21bd   : > { %v4234_v13 = vadd.f32 %v4929_v45, %v4533_v12  ;;  %v4228_v9 = vpop.f32.mrb[35].mxu0 }
0x21be   : > { %v4229_v47 = vadd.f32 %v4533_v12, %v4228_v9 }
0x21bf   : > { %v4238_v48 = vadd.f32 %v4234_v13, %v6192_v37 }
0x21c0   : > { %v4237_v49 = vadd.f32 %v4229_v47, %v6195_v27 }
0x21c1   : > { %v4246_v51 = vsel %vm496_vm0, %v4238_v48, 0.0 }
0x21c2   : > { %4247 = vadd.xlane.f32.xlu1 %v4246_v51  ;;  %v4243_v44 = vsel %vm496_vm0, %v4237_v49, 0.0 }
0x21c3   : > { %4244 = vadd.xlane.f32.xlu0 %v4243_v44 }
0x224f   : > { %v4248_v54 = vpop.xlane.xlu1 %4247 }
0x2250   : > { %v4250_v0 = vmul.f32 0.03125, %v4248_v54  ;;  %v4245_v29 = vpop.xlane.xlu0 %4244 }
0x2251   : > { %v4249_v7 = vmul.f32 0.03125, %v4245_v29 }
0x2252   : > { %v4252_v57 = vsub.f32 %v4238_v48, %v4250_v0 }
0x2253   : > { %v4251_v35 = vsub.f32 %v4237_v49, %v4249_v7 }
0x2254   : > { %v4254_v58 = vmul.f32 %v4252_v57, %v4252_v57 }
0x2255   : > { %v4253_v59 = vmul.f32 %v4251_v35, %v4251_v35 }
0x2256   : > { %v4258_v60 = vsel %vm496_vm0, %v4254_v58, 0.0 }
0x2257   : > { %4259 = vadd.xlane.f32.xlu1 %v4258_v60  ;;  %v4255_v37 = vsel %vm496_vm0, %v4253_v59, 0.0 }
0x2258   : > { %4256 = vadd.xlane.f32.xlu0 %v4255_v37 }
0x22e4   : > { %v4260_v27 = vpop.xlane.xlu1 %4259 }
0x22e5   : > { %v4262_v50 = vmul.f32 0.03125, %v4260_v27  ;;  %v4257_v61 = vpop.xlane.xlu0 %4256 }
0x22e6   : > { %v4261_v62 = vmul.f32 0.03125, %v4257_v61 }
0x22e7   : > { %v4264_v63 = vadd.f32 1e-05, %v4262_v50 }
0x22e8   : > { %v4263_v10 = vadd.f32 1e-05, %v4261_v62 }
0x22e9   : > { %5185 = vrsqrt.f32 %v4264_v63 }
0x22ea   : > { %5187 = vrsqrt.f32 %v4263_v10 }
0x22f3   : > { %v5186_v30 = vpop.eup %5185 }
0x22f4   : > { %v5188_v14 = vpop.eup %5187  ;;  %v4268_v26 = vmul.f32 %v5186_v30, %v4252_v57 }
0x22f5   : > { %v4267_v52 = vmul.f32 %v5188_v14, %v4251_v35 }
0x22f6   : > { %v4276_v4 = vmul.f32 %v4536_v1, %v4268_v26 }
0x22f7   : > { %v4275_v6 = vmul.f32 %v4536_v1, %v4267_v52 }
0x22f8   : > { %v4284_v8 = vadd.f32 %v4537_v2, %v4276_v4 }
0x22f9   : > { %v4283_v11 = vadd.f32 %v4537_v2, %v4275_v6 }
0x22fa   : > { %4286 = vst.msk [vmem:[%s485_s20 + $0x8] sm:$0xff] %vm496_vm0, %v4284_v8 }
0x22fb   : > { %4285 = vst.msk [vmem:[%s485_s20] sm:$0xff] %vm496_vm0, %v4283_v11 }
0x22fc   : > { %5292 = shalt.err (!%p5289_p6)
}
0x22fd   : > { %s5293_s2 = scalar_lea.hbm %s6269_s15, 256  ;;  %s5297_s13 = scalar_lea.hbm %s6393_s17, 512 }
0x22fe   : > { %p5294_p8 = scmp.ne.s32.totalorder %s6269_s15, %s5293_s2  ;;  %p5298_p4 = scmp.lt.u32.totalorder %s6269_s15, %s6393_s17 }
0x22ff   : > { %p5299_p11 = scmp.lt.u32.totalorder %s5297_s13, %s5293_s2  ;;  %p5301_p3 = scmp.lt.u32.totalorder %s5293_s2, %s6269_s15 }
0x2300   : > { %p5295_p10 = pnand %p5294_p8, %p5539_p12 }
0x2301   : > { %p5300_p13 = por %p5299_p11, %p5298_p4 }
0x2302   : > { %p5296_p0 = pneg %p5295_p10 }
0x2303   : > { %p5302_p7 = por %p5301_p3, %p5300_p13 }
0x2305   : > { %p5303_p9 = pnand %p5302_p7, %p5296_p0 }
0x2307   : > { %5306 = shalt.err (!%p5303_p9)
}
0x2308   : > { %s5379_s23 = smov 128  }
0x2309   : > { %5018 = dma.vmem_to_hbm [thread:$0]  (%p5539_p12), %s6271_s14, 256, %s6269_s15, %s4288_s25, %s5379_s23, %s5379_s23, %s6388_s27  }
0x230a PF: > { %s6394_s19 = sld [smem:[#allocation13_spill]]  ;;  %s6395_s21 = sld [smem:[#allocation15_spill]] }
0x230b   : > { %p6397_p5 = scmp.ge.s32.totalorder %s5353_s24, 2 }
0x2310   : > { %s4316_s28 = sand.u32 1, %s6394_s19   ;;  %p6396_p1 = scmp.ne.s32.totalorder %s6395_s21, 0 }
0x2311   : > { %s4317_s11 = scalar_lea.sflag [#allocation4], %s4316_s28 }
0x2312   : > { %p5032_p2 = pnand %p6397_p5, %p6396_p1 }
0x2314   : > { %5336 = dma.done.wait (!%p5032_p2), %s4317_s11, 256  }
0x2315   : > { %5338 = vsyncadd (!%p5032_p2), %s4317_s11, 4294967040  ;;  %s6398_s24 = sld [smem:[#allocation16_spill]]  ;;  %s6399_s12 = sld [smem:[#allocation14_spill]] }
0x2316   : > { %s6400_s23 = sld [smem:[#allocation17_spill]]  ;;  %s6401_s21 = smov %s5345_s22 }
0x231b   : > { %p28_p6 = scmp.ge.s32.totalorder %s6398_s24, 4   ;;  %s6402_s22 = smov %s6399_s12 }
0x231d   :  { %30 = sbr.rel (!%p28_p6) target bundleno = 12 (0xc), region = 148 }
0x2324   :  { %4322 = vsyncpa [#allocation3], 1 }
0x2325   :  { %4324 = vsyncpa [#allocation3 + $0x1], 1 }
0x2326   :  { %4325 = vsyncpa [#allocation6], 1 }
0x2327   :  { %4327 = vsyncpa [#allocation6 + $0x1], 1 }
0x2328   :  { %4328 = vsyncpa [#allocation4], 1 }
0x2329   :  { %4330 = vsyncpa [#allocation4 + $0x1], 1 }

</bundles_post_ra>
